<compile_context>
chip_gen: v7x
topology: tpu7x:2x2x1
jax: 0.10.0
libtpu: 0.0.40
codegen_flags: <defaults>
</compile_context>

<pallas_src>
import functools

import jax
import jax.numpy as jnp
from jax.experimental import pallas as pl
from jax.experimental.pallas import tpu as pltpu

LANE = 128


def _round_up(n, m):
    return (n + m - 1) // m * m


# ----------------------------------------------------------------------------
# Fused Pallas kernel: whole VAE forward for one batch tile.
# ----------------------------------------------------------------------------
def _vae_fused_kernel(
    x_ref, eps_ref,
    w1_ref, b1_ref, w2_ref, b2_ref, w3_ref, b3_ref,
    w4_ref, b4_ref, w5_ref, b5_ref, w6_ref, b6_ref,
    recon_ref, stats_ref,
    *, z_pad,
):
    f32 = jnp.float32

    def dense(h, w_ref, b_ref):
        # bf16 x bf16 matmul with f32 accumulation on the MXU; f32 bias row.
        return jnp.dot(h.astype(w_ref.dtype), w_ref[...],
                       preferred_element_type=f32) + b_ref[...]

    x = x_ref[...]

    # ---- encoder ----
    h = jnp.maximum(dense(x, w1_ref, b1_ref), 0.0)      # fc1 + relu
    h = jnp.maximum(dense(h, w2_ref, b2_ref), 0.0)      # fc2 + relu
    stats = dense(h, w3_ref, b3_ref)                     # [mu || log_var], lane-padded
    mu = stats[:, :z_pad]                                # 128-lane-aligned slices
    log_var = stats[:, z_pad:]

    # ---- reparameterization: z = mu + eps * exp(0.5 * log_var) ----
    # Padded lanes: log_var = 0, eps = 0, mu = 0 -> z stays 0 (and fc4's
    # padded weight rows are zero anyway).
    z = mu + eps_ref[...].astype(f32) * jnp.exp(0.5 * log_var)

    # ---- decoder ----
    h = jnp.maximum(dense(z, w4_ref, b4_ref), 0.0)       # fc4 + relu
    h = jnp.maximum(dense(h, w5_ref, b5_ref), 0.0)       # fc5 + relu
    recon = jax.nn.sigmoid(dense(h, w6_ref, b6_ref))     # fc6 + sigmoid (lane-padded)

    recon_ref[...] = recon.astype(recon_ref.dtype)
    stats_ref[...] = stats.astype(stats_ref.dtype)


# ----------------------------------------------------------------------------
# Parameters: canonical (PyTorch-like) init + one-time repack for the kernel.
# ----------------------------------------------------------------------------
def init_vae_params(key, x_dim, h_dim1, h_dim2, z_dim, dtype=jnp.float32):
    """nn.Linear-equivalent params, stored transposed as (in, out)."""
    dims = [
        ("fc1", x_dim, h_dim1), ("fc2", h_dim1, h_dim2),
        ("fc31", h_dim2, z_dim), ("fc32", h_dim2, z_dim),
        ("fc4", z_dim, h_dim2), ("fc5", h_dim2, h_dim1),
        ("fc6", h_dim1, x_dim),
    ]
    params = {}
    for name, d_in, d_out in dims:
        key, kw, kb = jax.random.split(key, 3)
        bound = 1.0 / (d_in ** 0.5)
        params[name] = {
            "w": jax.random.uniform(kw, (d_in, d_out), dtype, -bound, bound),
            "b": jax.random.uniform(kb, (d_out,), dtype, -bound, bound),
        }
    return params


def pack_vae_params(params, x_dim=784, compute_dtype=jnp.bfloat16):
    """One-time repack into the fused-kernel layout:
       * fc31/fc32 each zero-padded to 128 output lanes, then merged so the
         stats matmul yields mu in lanes [0,128) and log_var in [128,256),
       * fc4 contraction dim zero-padded z_dim -> 128,
       * fc6 output zero-padded to a multiple of 128 lanes,
       * weights cast to bf16 (MXU operands); biases kept f32 as (1, N) rows."""
    z_dim = params["fc31"]["w"].shape[1]
    z_pad = _round_up(z_dim, LANE)
    x_pad = _round_up(x_dim, LANE)

    def w(name):
        return params[name]["w"]

    def b(name):
        return params[name]["b"]

    w31 = jnp.pad(w("fc31"), ((0, 0), (0, z_pad - z_dim)))
    w32 = jnp.pad(w("fc32"), ((0, 0), (0, z_pad - z_dim)))
    w3 = jnp.concatenate([w31, w32], axis=1)
    b3 = jnp.concatenate([jnp.pad(b("fc31"), (0, z_pad - z_dim)),
                          jnp.pad(b("fc32"), (0, z_pad - z_dim))])

    w4 = jnp.pad(w("fc4"), ((0, z_pad - z_dim), (0, 0)))
    w6 = jnp.pad(w("fc6"), ((0, 0), (0, x_pad - x_dim)))
    b6 = jnp.pad(b("fc6"), (0, x_pad - x_dim))

    def cw(a):
        return a.astype(compute_dtype)

    def row(a):
        return a.reshape(1, -1).astype(jnp.float32)

    return (cw(w("fc1")), row(b("fc1")),
            cw(w("fc2")), row(b("fc2")),
            cw(w3), row(b3),
            cw(w4), row(b("fc4")),
            cw(w("fc5")), row(b("fc5")),
            cw(w6), row(b6))


# ----------------------------------------------------------------------------
# Forward: mirrors VAE.forward -> (recon_x, mu, log_var)
# ----------------------------------------------------------------------------
def vae_forward(packed, x, eps, *, x_dim=784, m_tile=1024, trim_recon=True):
    h1 = packed[0].shape[1]
    h2 = packed[2].shape[1]
    z_pad = packed[6].shape[0]       # padded z width (128)
    x_pad = packed[10].shape[1]      # padded fc6 output width (multiple of 128)

    x2 = x.reshape(-1, x_dim)
    M = x2.shape[0]
    z_dim = eps.shape[-1]
    eps2 = eps.reshape(M, z_dim).astype(jnp.float32)
    if z_dim < z_pad:
        # Tiny pad to 128 lanes so z stays lane-aligned in the kernel.
        eps2 = jnp.pad(eps2, ((0, 0), (0, z_pad - z_dim)))

    # Batch tile: multiple of 8 sublanes, >= 2 grid steps when possible (so
    # ("parallel",) shards the batch across both v7x TensorCores), capped at
    # m_tile rows (double-buffered working set stays well inside 64 MiB VMEM).
    if M <= 8:
        tm = M
    else:
        tm = min(m_tile, _round_up(pl.cdiv(M, 2), 8))
    grid = (pl.cdiv(M, tm),)   # ragged last block handled by Pallas (no jnp.pad copy)

    def act(n):
        return pl.BlockSpec((tm, n), lambda i: (i, 0))

    def resident(p):
        # Weights/biases: same block every grid step -> stay resident in VMEM.
        return pl.BlockSpec(p.shape, lambda i: (0, 0))

    in_specs = [act(x_dim), act(z_pad)] + [resident(p) for p in packed]
    out_specs = [act(x_pad), act(2 * z_pad)]
    out_shape = [
        jax.ShapeDtypeStruct((M, x_pad), jnp.float32),
        jax.ShapeDtypeStruct((M, 2 * z_pad), jnp.float32),
    ]

    # Scheduler hints: whole-forward FLOPs / transcendentals / HBM bytes.
    flops_per_row = 2 * (x_dim * h1 + h1 * h2 + h2 * 2 * z_pad
                         + z_pad * h2 + h2 * h1 + h1 * x_pad)
    w_bytes = sum(int(p.size) * p.dtype.itemsize for p in packed)
    io_bytes = M * (x_dim * x2.dtype.itemsize + 4 * (z_pad + x_pad + 2 * z_pad))
    cost = pl.CostEstimate(
        flops=int(M) * int(flops_per_row),
        transcendentals=int(M) * int(z_pad + x_pad),
        bytes_accessed=int(w_bytes + io_bytes),
    )

    # VMEM budget: double-buffered I/O tiles + resident weights + live
    # intermediates + headroom (capped at v7x's 64 MiB physical VMEM).
    tile_io = tm * (x_dim * x2.dtype.itemsize + 4 * (z_pad + x_pad + 2 * z_pad))
    tile_interm = tm * 4 * (h1 + h2 + 2 * z_pad + z_pad + h2 + h1)
    vmem_limit = min(int(2 * (w_bytes + tile_io) + 2 * tile_interm) + (16 << 20),
                     64 << 20)

    kernel = functools.partial(_vae_fused_kernel, z_pad=z_pad)
    recon_p, stats = pl.pallas_call(
        kernel,
        out_shape=out_shape,
        grid_spec=pltpu.PrefetchScalarGridSpec(
            num_scalar_prefetch=0,
            grid=grid,
            in_specs=in_specs,
            out_specs=out_specs,
        ),
        compiler_params=pltpu.CompilerParams(
            dimension_semantics=("parallel",),
            vmem_limit_bytes=vmem_limit,
        ),
        cost_estimate=cost,
    )(x2, eps2, *packed)

    mu = stats[:, :z_dim]
    log_var = stats[:, z_pad:z_pad + z_dim]
    # Downstream consumers that can mask the padded lanes (e.g. a BCE loss)
    # should pass trim_recon=False and skip this slice copy entirely.
    recon = recon_p[:, :x_dim] if trim_recon else recon_p
    return recon, mu, log_var


# ----------------------------------------------------------------------------
# Demo + correctness check against a plain-JAX f32 reference.
# ----------------------------------------------------------------------------
if __name__ == "__main__":
    # x_dim MUST be 784 (forward hardcodes view(-1, 784)); MNIST-like shapes.
    B, X_DIM, H1, H2, Z = 8, 784, 256, 128, 32

    key = jax.random.PRNGKey(0)
    k_params, k_x, k_eps = jax.random.split(key, 3)

    params = init_vae_params(k_params, X_DIM, H1, H2, Z)
    packed = pack_vae_params(params, X_DIM)

    x = jax.random.uniform(k_x, (B, 1, 28, 28), jnp.float32)
    # TODO(synk): torch.randn_like draws eps inside sampling(); here eps is an
    # explicit deterministic input from jax.random (same math, reproducible).
    eps = jax.random.normal(k_eps, (B, Z), jnp.float32)

    fwd = jax.jit(functools.partial(vae_forward, x_dim=X_DIM))
    recon, mu, log_var = fwd(packed, x, eps)
    jax.block_until_ready((recon, mu, log_var))

    def ref_forward(params, x, eps):
        xf = x.reshape(-1, 784)
        h = jax.nn.relu(xf @ params["fc1"]["w"] + params["fc1"]["b"])
        h = jax.nn.relu(h @ params["fc2"]["w"] + params["fc2"]["b"])
        mu = h @ params["fc31"]["w"] + params["fc31"]["b"]
        lv = h @ params["fc32"]["w"] + params["fc32"]["b"]
        z = mu + eps * jnp.exp(0.5 * lv)
        h = jax.nn.relu(z @ params["fc4"]["w"] + params["fc4"]["b"])
        h = jax.nn.relu(h @ params["fc5"]["w"] + params["fc5"]["b"])
        return jax.nn.sigmoid(h @ params["fc6"]["w"] + params["fc6"]["b"]), mu, lv

    r_ref, mu_ref, lv_ref = ref_forward(params, x, eps)
    assert recon.shape == (B, 784) and mu.shape == (B, Z) and log_var.shape == (B, Z)
    # bf16 MXU operands (f32 accumulation): loosened tolerance vs f32 reference.
    assert jnp.allclose(recon, r_ref, atol=2e-2, rtol=2e-2)
    assert jnp.allclose(mu, mu_ref, atol=2e-2, rtol=2e-2)
    assert jnp.allclose(log_var, lv_ref, atol=2e-2, rtol=2e-2)

    print("KERNEL_OK")
</pallas_src>

<mosaic_0001>
module attributes {stable_mosaic.version = 11 : i64} {
  func.func @_vae_fused_kernel(%arg0: i32, %arg1: memref<8x784xf32, #tpu.memory_space<vmem>>, %arg2: memref<8x128xf32, #tpu.memory_space<vmem>>, %arg3: memref<784x256xbf16, #tpu.memory_space<vmem>>, %arg4: memref<1x256xf32, #tpu.memory_space<vmem>>, %arg5: memref<256x128xbf16, #tpu.memory_space<vmem>>, %arg6: memref<1x128xf32, #tpu.memory_space<vmem>>, %arg7: memref<128x256xbf16, #tpu.memory_space<vmem>>, %arg8: memref<1x256xf32, #tpu.memory_space<vmem>>, %arg9: memref<128x128xbf16, #tpu.memory_space<vmem>>, %arg10: memref<1x128xf32, #tpu.memory_space<vmem>>, %arg11: memref<128x256xbf16, #tpu.memory_space<vmem>>, %arg12: memref<1x256xf32, #tpu.memory_space<vmem>>, %arg13: memref<256x896xbf16, #tpu.memory_space<vmem>>, %arg14: memref<1x896xf32, #tpu.memory_space<vmem>>, %arg15: memref<8x896xf32, #tpu.memory_space<vmem>>, %arg16: memref<8x256xf32, #tpu.memory_space<vmem>>) attributes {dimension_semantics = [#tpu.dimension_semantics<parallel>], iteration_bounds = array<i64: 1>, scalar_prefetch = 0 : i64, scratch_operands = 0 : i64, tpu.core_type = #tpu.core_type<tc>, window_params = [{transform_indices = @transform_0, window_bounds = array<i64: 8, 784>}, {transform_indices = @transform_1, window_bounds = array<i64: 8, 128>}, {pipeline_mode = #tpu.pipeline_mode<synchronous>, transform_indices = @transform_2, window_bounds = array<i64: 784, 256>}, {pipeline_mode = #tpu.pipeline_mode<synchronous>, transform_indices = @transform_3, window_bounds = array<i64: 1, 256>}, {pipeline_mode = #tpu.pipeline_mode<synchronous>, transform_indices = @transform_4, window_bounds = array<i64: 256, 128>}, {pipeline_mode = #tpu.pipeline_mode<synchronous>, transform_indices = @transform_5, window_bounds = array<i64: 1, 128>}, {pipeline_mode = #tpu.pipeline_mode<synchronous>, transform_indices = @transform_6, window_bounds = array<i64: 128, 256>}, {pipeline_mode = #tpu.pipeline_mode<synchronous>, transform_indices = @transform_7, window_bounds = array<i64: 1, 256>}, {pipeline_mode = #tpu.pipeline_mode<synchronous>, transform_indices = @transform_8, window_bounds = array<i64: 128, 128>}, {pipeline_mode = #tpu.pipeline_mode<synchronous>, transform_indices = @transform_9, window_bounds = array<i64: 1, 128>}, {pipeline_mode = #tpu.pipeline_mode<synchronous>, transform_indices = @transform_10, window_bounds = array<i64: 128, 256>}, {pipeline_mode = #tpu.pipeline_mode<synchronous>, transform_indices = @transform_11, window_bounds = array<i64: 1, 256>}, {pipeline_mode = #tpu.pipeline_mode<synchronous>, transform_indices = @transform_12, window_bounds = array<i64: 256, 896>}, {pipeline_mode = #tpu.pipeline_mode<synchronous>, transform_indices = @transform_13, window_bounds = array<i64: 1, 896>}, {transform_indices = @transform_14, window_bounds = array<i64: 8, 896>}, {transform_indices = @transform_15, window_bounds = array<i64: 8, 256>}]} {
    %c0 = arith.constant 0 : index
    %c0_0 = arith.constant 0 : index
    %0 = vector.load %arg1[%c0, %c0_0] : memref<8x784xf32, #tpu.memory_space<vmem>>, vector<8x784xf32>
    %1 = arith.truncf %0 : vector<8x784xf32> to vector<8x784xbf16>
    %c0_1 = arith.constant 0 : index
    %c0_2 = arith.constant 0 : index
    %2 = vector.load %arg3[%c0_1, %c0_2] : memref<784x256xbf16, #tpu.memory_space<vmem>>, vector<784x256xbf16>
    %cst = arith.constant dense<0.000000e+00> : vector<8x256xf32>
    %3 = tpu.matmul %1, %2, %cst {dimension_numbers = #tpu.dot_dimension_numbers<[1], [0], [0], [1], [0, 0, 1, 1], [], []>} : vector<8x784xbf16>, vector<784x256xbf16>, vector<8x256xf32> -> vector<8x256xf32>
    %c0_3 = arith.constant 0 : index
    %c0_4 = arith.constant 0 : index
    %4 = vector.load %arg4[%c0_3, %c0_4] : memref<1x256xf32, #tpu.memory_space<vmem>>, vector<1x256xf32>
    %5 = vector.broadcast %4 : vector<1x256xf32> to vector<8x256xf32>
    %6 = arith.addf %3, %5 : vector<8x256xf32>
    %cst_5 = arith.constant 0.000000e+00 : f32
    %7 = vector.broadcast %cst_5 : f32 to vector<8x256xf32>
    %8 = arith.maximumf %6, %7 : vector<8x256xf32>
    %9 = arith.truncf %8 : vector<8x256xf32> to vector<8x256xbf16>
    %c0_6 = arith.constant 0 : index
    %c0_7 = arith.constant 0 : index
    %10 = vector.load %arg5[%c0_6, %c0_7] : memref<256x128xbf16, #tpu.memory_space<vmem>>, vector<256x128xbf16>
    %cst_8 = arith.constant dense<0.000000e+00> : vector<8x128xf32>
    %11 = tpu.matmul %9, %10, %cst_8 {dimension_numbers = #tpu.dot_dimension_numbers<[1], [0], [0], [1], [0, 0, 1, 1], [], []>} : vector<8x256xbf16>, vector<256x128xbf16>, vector<8x128xf32> -> vector<8x128xf32>
    %c0_9 = arith.constant 0 : index
    %c0_10 = arith.constant 0 : index
    %12 = vector.load %arg6[%c0_9, %c0_10] : memref<1x128xf32, #tpu.memory_space<vmem>>, vector<1x128xf32>
    %13 = vector.broadcast %12 : vector<1x128xf32> to vector<8x128xf32>
    %14 = arith.addf %11, %13 : vector<8x128xf32>
    %cst_11 = arith.constant 0.000000e+00 : f32
    %15 = vector.broadcast %cst_11 : f32 to vector<8x128xf32>
    %16 = arith.maximumf %14, %15 : vector<8x128xf32>
    %17 = arith.truncf %16 : vector<8x128xf32> to vector<8x128xbf16>
    %c0_12 = arith.constant 0 : index
    %c0_13 = arith.constant 0 : index
    %18 = vector.load %arg7[%c0_12, %c0_13] : memref<128x256xbf16, #tpu.memory_space<vmem>>, vector<128x256xbf16>
    %cst_14 = arith.constant dense<0.000000e+00> : vector<8x256xf32>
    %19 = tpu.matmul %17, %18, %cst_14 {dimension_numbers = #tpu.dot_dimension_numbers<[1], [0], [0], [1], [0, 0, 1, 1], [], []>} : vector<8x128xbf16>, vector<128x256xbf16>, vector<8x256xf32> -> vector<8x256xf32>
    %c0_15 = arith.constant 0 : index
    %c0_16 = arith.constant 0 : index
    %20 = vector.load %arg8[%c0_15, %c0_16] : memref<1x256xf32, #tpu.memory_space<vmem>>, vector<1x256xf32>
    %21 = vector.broadcast %20 : vector<1x256xf32> to vector<8x256xf32>
    %22 = arith.addf %19, %21 : vector<8x256xf32>
    %23 = vector.extract_strided_slice %22 {offsets = [0, 0], sizes = [8, 128], strides = [1, 1]} : vector<8x256xf32> to vector<8x128xf32>
    %24 = vector.extract_strided_slice %22 {offsets = [0, 128], sizes = [8, 128], strides = [1, 1]} : vector<8x256xf32> to vector<8x128xf32>
    %c0_17 = arith.constant 0 : index
    %c0_18 = arith.constant 0 : index
    %25 = vector.load %arg2[%c0_17, %c0_18] : memref<8x128xf32, #tpu.memory_space<vmem>>, vector<8x128xf32>
    %cst_19 = arith.constant 5.000000e-01 : f32
    %26 = vector.broadcast %cst_19 : f32 to vector<8x128xf32>
    %27 = arith.mulf %26, %24 : vector<8x128xf32>
    %28 = math.exp %27 : vector<8x128xf32>
    %29 = arith.mulf %25, %28 : vector<8x128xf32>
    %30 = arith.addf %23, %29 : vector<8x128xf32>
    %31 = arith.truncf %30 : vector<8x128xf32> to vector<8x128xbf16>
    %c0_20 = arith.constant 0 : index
    %c0_21 = arith.constant 0 : index
    %32 = vector.load %arg9[%c0_20, %c0_21] : memref<128x128xbf16, #tpu.memory_space<vmem>>, vector<128x128xbf16>
    %cst_22 = arith.constant dense<0.000000e+00> : vector<8x128xf32>
    %33 = tpu.matmul %31, %32, %cst_22 {dimension_numbers = #tpu.dot_dimension_numbers<[1], [0], [0], [1], [0, 0, 1, 1], [], []>} : vector<8x128xbf16>, vector<128x128xbf16>, vector<8x128xf32> -> vector<8x128xf32>
    %c0_23 = arith.constant 0 : index
    %c0_24 = arith.constant 0 : index
    %34 = vector.load %arg10[%c0_23, %c0_24] : memref<1x128xf32, #tpu.memory_space<vmem>>, vector<1x128xf32>
    %35 = vector.broadcast %34 : vector<1x128xf32> to vector<8x128xf32>
    %36 = arith.addf %33, %35 : vector<8x128xf32>
    %cst_25 = arith.constant 0.000000e+00 : f32
    %37 = vector.broadcast %cst_25 : f32 to vector<8x128xf32>
    %38 = arith.maximumf %36, %37 : vector<8x128xf32>
    %39 = arith.truncf %38 : vector<8x128xf32> to vector<8x128xbf16>
    %c0_26 = arith.constant 0 : index
    %c0_27 = arith.constant 0 : index
    %40 = vector.load %arg11[%c0_26, %c0_27] : memref<128x256xbf16, #tpu.memory_space<vmem>>, vector<128x256xbf16>
    %cst_28 = arith.constant dense<0.000000e+00> : vector<8x256xf32>
    %41 = tpu.matmul %39, %40, %cst_28 {dimension_numbers = #tpu.dot_dimension_numbers<[1], [0], [0], [1], [0, 0, 1, 1], [], []>} : vector<8x128xbf16>, vector<128x256xbf16>, vector<8x256xf32> -> vector<8x256xf32>
    %c0_29 = arith.constant 0 : index
    %c0_30 = arith.constant 0 : index
    %42 = vector.load %arg12[%c0_29, %c0_30] : memref<1x256xf32, #tpu.memory_space<vmem>>, vector<1x256xf32>
    %43 = vector.broadcast %42 : vector<1x256xf32> to vector<8x256xf32>
    %44 = arith.addf %41, %43 : vector<8x256xf32>
    %cst_31 = arith.constant 0.000000e+00 : f32
    %45 = vector.broadcast %cst_31 : f32 to vector<8x256xf32>
    %46 = arith.maximumf %44, %45 : vector<8x256xf32>
    %47 = arith.truncf %46 : vector<8x256xf32> to vector<8x256xbf16>
    %c0_32 = arith.constant 0 : index
    %c0_33 = arith.constant 0 : index
    %48 = vector.load %arg13[%c0_32, %c0_33] : memref<256x896xbf16, #tpu.memory_space<vmem>>, vector<256x896xbf16>
    %cst_34 = arith.constant dense<0.000000e+00> : vector<8x896xf32>
    %49 = tpu.matmul %47, %48, %cst_34 {dimension_numbers = #tpu.dot_dimension_numbers<[1], [0], [0], [1], [0, 0, 1, 1], [], []>} : vector<8x256xbf16>, vector<256x896xbf16>, vector<8x896xf32> -> vector<8x896xf32>
    %c0_35 = arith.constant 0 : index
    %c0_36 = arith.constant 0 : index
    %50 = vector.load %arg14[%c0_35, %c0_36] : memref<1x896xf32, #tpu.memory_space<vmem>>, vector<1x896xf32>
    %51 = vector.broadcast %50 : vector<1x896xf32> to vector<8x896xf32>
    %52 = arith.addf %49, %51 : vector<8x896xf32>
    %53 = arith.negf %52 : vector<8x896xf32>
    %54 = math.exp %53 : vector<8x896xf32>
    %cst_37 = arith.constant 1.000000e+00 : f32
    %55 = vector.broadcast %cst_37 : f32 to vector<8x896xf32>
    %56 = arith.addf %55, %54 : vector<8x896xf32>
    %57 = arith.divf %55, %56 : vector<8x896xf32>
    %c0_38 = arith.constant 0 : index
    %c0_39 = arith.constant 0 : index
    %58 = vector.load %arg15[%c0_38, %c0_39] : memref<8x896xf32, #tpu.memory_space<vmem>>, vector<8x896xf32>
    tpu.vector_store %arg15[%c0_38, %c0_39], %57 {strides = array<i32>} : memref<8x896xf32, #tpu.memory_space<vmem>>, vector<8x896xf32>,
    %c0_40 = arith.constant 0 : index
    %c0_41 = arith.constant 0 : index
    %59 = vector.load %arg16[%c0_40, %c0_41] : memref<8x256xf32, #tpu.memory_space<vmem>>, vector<8x256xf32>
    tpu.vector_store %arg16[%c0_40, %c0_41], %22 {strides = array<i32>} : memref<8x256xf32, #tpu.memory_space<vmem>>, vector<8x256xf32>,
    return
  }
  func.func @transform_0(%arg0: i32) -> (i32, i32) {
    %c0_i32 = arith.constant 0 : i32
    %c0_i32_0 = arith.constant 0 : i32
    return %arg0, %c0_i32 : i32, i32
  }
  func.func @transform_1(%arg0: i32) -> (i32, i32) {
    %c0_i32 = arith.constant 0 : i32
    %c0_i32_0 = arith.constant 0 : i32
    return %arg0, %c0_i32 : i32, i32
  }
  func.func @transform_2(%arg0: i32) -> (i32, i32) {
    %c0_i32 = arith.constant 0 : i32
    %c0_i32_0 = arith.constant 0 : i32
    %c0_i32_1 = arith.constant 0 : i32
    return %c0_i32, %c0_i32_0 : i32, i32
  }
  func.func @transform_3(%arg0: i32) -> (i32, i32) {
    %c0_i32 = arith.constant 0 : i32
    %c0_i32_0 = arith.constant 0 : i32
    %c0_i32_1 = arith.constant 0 : i32
    return %c0_i32, %c0_i32_0 : i32, i32
  }
  func.func @transform_4(%arg0: i32) -> (i32, i32) {
    %c0_i32 = arith.constant 0 : i32
    %c0_i32_0 = arith.constant 0 : i32
    %c0_i32_1 = arith.constant 0 : i32
    return %c0_i32, %c0_i32_0 : i32, i32
  }
  func.func @transform_5(%arg0: i32) -> (i32, i32) {
    %c0_i32 = arith.constant 0 : i32
    %c0_i32_0 = arith.constant 0 : i32
    %c0_i32_1 = arith.constant 0 : i32
    return %c0_i32, %c0_i32_0 : i32, i32
  }
  func.func @transform_6(%arg0: i32) -> (i32, i32) {
    %c0_i32 = arith.constant 0 : i32
    %c0_i32_0 = arith.constant 0 : i32
    %c0_i32_1 = arith.constant 0 : i32
    return %c0_i32, %c0_i32_0 : i32, i32
  }
  func.func @transform_7(%arg0: i32) -> (i32, i32) {
    %c0_i32 = arith.constant 0 : i32
    %c0_i32_0 = arith.constant 0 : i32
    %c0_i32_1 = arith.constant 0 : i32
    return %c0_i32, %c0_i32_0 : i32, i32
  }
  func.func @transform_8(%arg0: i32) -> (i32, i32) {
    %c0_i32 = arith.constant 0 : i32
    %c0_i32_0 = arith.constant 0 : i32
    %c0_i32_1 = arith.constant 0 : i32
    return %c0_i32, %c0_i32_0 : i32, i32
  }
  func.func @transform_9(%arg0: i32) -> (i32, i32) {
    %c0_i32 = arith.constant 0 : i32
    %c0_i32_0 = arith.constant 0 : i32
    %c0_i32_1 = arith.constant 0 : i32
    return %c0_i32, %c0_i32_0 : i32, i32
  }
  func.func @transform_10(%arg0: i32) -> (i32, i32) {
    %c0_i32 = arith.constant 0 : i32
    %c0_i32_0 = arith.constant 0 : i32
    %c0_i32_1 = arith.constant 0 : i32
    return %c0_i32, %c0_i32_0 : i32, i32
  }
  func.func @transform_11(%arg0: i32) -> (i32, i32) {
    %c0_i32 = arith.constant 0 : i32
    %c0_i32_0 = arith.constant 0 : i32
    %c0_i32_1 = arith.constant 0 : i32
    return %c0_i32, %c0_i32_0 : i32, i32
  }
  func.func @transform_12(%arg0: i32) -> (i32, i32) {
    %c0_i32 = arith.constant 0 : i32
    %c0_i32_0 = arith.constant 0 : i32
    %c0_i32_1 = arith.constant 0 : i32
    return %c0_i32, %c0_i32_0 : i32, i32
  }
  func.func @transform_13(%arg0: i32) -> (i32, i32) {
    %c0_i32 = arith.constant 0 : i32
    %c0_i32_0 = arith.constant 0 : i32
    %c0_i32_1 = arith.constant 0 : i32
    return %c0_i32, %c0_i32_0 : i32, i32
  }
  func.func @transform_14(%arg0: i32) -> (i32, i32) {
    %c0_i32 = arith.constant 0 : i32
    %c0_i32_0 = arith.constant 0 : i32
    return %arg0, %c0_i32 : i32, i32
  }
  func.func @transform_15(%arg0: i32) -> (i32, i32) {
    %c0_i32 = arith.constant 0 : i32
    %c0_i32_0 = arith.constant 0 : i32
    return %arg0, %c0_i32 : i32, i32
  }
}

</mosaic_0001>

<bundles_post_ra>
// kernel: vae_forward.1
= control target key start
LH: loop header
LB: loop body
LE: loop exit
PB: predicated region body
PF: predicated region fallthrough
CT: control target
= control target key end

     0   :  { %s4133_s0 = inlined_call_operand.vmem [shape: f32[8,784], index: 0, kind: input, shape index: {}]   ;;  %s4134_s1 = inlined_call_operand.vmem [shape: f32[8,128], index: 1, kind: input, shape index: {}]   ;;  %s4135_s2 = inlined_call_operand.vmem [shape: bf16[784,256], index: 2, kind: input, shape index: {}]   ;;  %s4136_s3 = inlined_call_operand.vmem [shape: f32[1,256], index: 3, kind: input, shape index: {}]   ;;  %s4137_s4 = inlined_call_operand.hbm [shape: bf16[256,128], index: 4, kind: input, shape index: {}]   ;;  %s4138_s5 = inlined_call_operand.vmem [shape: f32[1,128], index: 5, kind: input, shape index: {}]   ;;  %s4139_s6 = inlined_call_operand.hbm [shape: bf16[128,256], index: 6, kind: input, shape index: {}]   ;;  %s4140_s7 = inlined_call_operand.hbm [shape: f32[1,256], index: 7, kind: input, shape index: {}]   ;;  %s4141_s8 = inlined_call_operand.vmem [shape: bf16[128,128], index: 8, kind: input, shape index: {}]   ;;  %s4142_s9 = inlined_call_operand.hbm [shape: f32[1,128], index: 9, kind: input, shape index: {}]   ;;  %s4143_s10 = inlined_call_operand.hbm [shape: bf16[128,256], index: 10, kind: input, shape index: {}]   ;;  %s4144_s11 = inlined_call_operand.hbm [shape: f32[1,256], index: 11, kind: input, shape index: {}]   ;;  %s4145_s12 = inlined_call_operand.hbm [shape: bf16[256,896], index: 12, kind: input, shape index: {}]   ;;  %s4146_s13 = inlined_call_operand.hbm [shape: f32[1,896], index: 13, kind: input, shape index: {}]   ;;  %s4147_s14 = inlined_call_operand.hbm [shape: f32[8,896], index: 14, kind: output, shape index: {0}]   ;;  %s4148_s15 = inlined_call_operand.vmem [shape: f32[8,256], index: 15, kind: output, shape index: {1}]  }
   0x1   :  { %4150 = sst [smem:[#allocation23_spill]] %s4147_s14 }
   0x2   :  { %21 = vsyncpa [#allocation3], 0 }
   0x3   :  { %22 = vsyncpa [#allocation6], 0 }
   0x4   :  { %23 = vsyncpa [#allocation9], 0 }
   0x5   :  { %24 = vsyncpa [#allocation12], 0 }
   0x6   :  { %25 = vsyncpa [#allocation15], 0 }
   0x7   :  { %26 = vsyncpa [#allocation4], 0  ;;  %s3515_s18 = smov [#allocation5]   ;;  %s3305_s22 = scalar_lea.hbm %s4139_s6, 2048 }
   0x8   :  { %s54_s19 = sshll.u32 %s3515_s18, 4  ;;  %p3306_p0 = scmp.ne.s32.totalorder %s4139_s6, %s3305_s22  ;;  %s55_s19 = int_to_ptr.vmem [resolvable:$true] %s54_s19 }
   0x9   :  { %p3309_p1 = scmp.lt.u32.totalorder %s3305_s22, %s4139_s6 }
   0xb   :  { %p3311_p2 = pnand %p3309_p1, %p3306_p0 }
   0xd   :  { %3314 = shalt.err (!%p3311_p2)
}
   0xe   :  { %s3315_s27 = scalar_lea.vmem %s55_s19, 2048  ;;  %p3320_p4 = scmp.lt.s32.totalorder %s55_s19, %s55_s19 }
   0xf   :  { %p3316_p3 = scmp.ne.s32.totalorder %s55_s19, %s3315_s27  ;;  %p3321_p5 = scmp.lt.s32.totalorder %s3315_s27, %s3315_s27 }
  0x11   :  { %p3322_p6 = por %p3321_p5, %p3320_p4 }
  0x13   :  { %p3323_p7 = pnand %p3322_p6, %p3316_p3 }
  0x15   :  { %3326 = shalt.err (!%p3323_p7)
}
  0x16   :  { %s3516_s28 = smov 128   ;;  %s3517_s29 = smov 8  }
  0x17   :  { %60 = dma.hbm_to_vmem [thread:$0]  %s4139_s6, 2048, %s55_s19, [#allocation6], %s3516_s28, %s3516_s28, %s3517_s29  }
  0x18   :  { %s3518_s17 = smov [#allocation8]   ;;  %s3519_s20 = smov [#allocation11]  }
  0x19   :  { %s79_s18 = sshll.u32 %s3518_s17, 4  ;;  %s101_s21 = sshll.u32 %s3519_s20, 4  ;;  %s80_s18 = int_to_ptr.vmem [resolvable:$true] %s79_s18  ;;  %s102_s21 = int_to_ptr.vmem [resolvable:$true] %s101_s21 }
  0x1a   :  { %s3327_s24 = scalar_lea.hbm %s4142_s9, 16 }
  0x1b   :  { %p3328_p8 = scmp.ne.s32.totalorder %s4142_s9, %s3327_s24  ;;  %p3331_p9 = scmp.lt.u32.totalorder %s3327_s24, %s4142_s9 }
  0x1d   :  { %p3333_p10 = pnand %p3331_p9, %p3328_p8 }
  0x1f   :  { %3336 = shalt.err (!%p3333_p10)
}
  0x20   :  { %s3337_s6 = scalar_lea.vmem %s80_s18, 16  ;;  %s3341_s19 = scalar_lea.vmem %s80_s18, 32 }
  0x21   :  { %p3338_p11 = scmp.ne.s32.totalorder %s80_s18, %s3337_s6  ;;  %p3342_p12 = scmp.lt.s32.totalorder %s80_s18, %s80_s18 }
  0x22   :  { %p3343_p13 = scmp.lt.s32.totalorder %s3341_s19, %s3337_s6 }
  0x24   :  { %p3344_p0 = por %p3343_p13, %p3342_p12 }
  0x26   :  { %p3345_p1 = pnand %p3344_p0, %p3338_p11 }
  0x28   :  { %3348 = shalt.err (!%p3345_p1)
}
  0x29   :  { %82 = dma.hbm_to_vmem [thread:$0]  %s4142_s9, 16, %s80_s18, [#allocation9]  }
  0x2a   :  { %s3349_s14 = scalar_lea.hbm %s4144_s11, 32 }
  0x2b   :  { %p3350_p2 = scmp.ne.s32.totalorder %s4144_s11, %s3349_s14  ;;  %p3353_p3 = scmp.lt.u32.totalorder %s3349_s14, %s4144_s11 }
  0x2d   :  { %p3355_p4 = pnand %p3353_p3, %p3350_p2 }
  0x2f   :  { %3358 = shalt.err (!%p3355_p4)
}
  0x30   :  { %s3359_s26 = scalar_lea.vmem %s102_s21, 32  ;;  %p3364_p6 = scmp.lt.s32.totalorder %s102_s21, %s102_s21 }
  0x31   :  { %p3360_p5 = scmp.ne.s32.totalorder %s102_s21, %s3359_s26  ;;  %p3365_p7 = scmp.lt.s32.totalorder %s3359_s26, %s3359_s26 }
  0x33   :  { %p3366_p8 = por %p3365_p7, %p3364_p6 }
  0x35   :  { %p3367_p9 = pnand %p3366_p8, %p3360_p5 }
  0x37   :  { %3370 = shalt.err (!%p3367_p9)
}
  0x38   :  { %104 = dma.hbm_to_vmem [thread:$0]  %s4144_s11, 32, %s102_s21, [#allocation12]  }
  0x39   :  { %s3520_s27 = smov [#allocation2]   ;;  %s3371_s16 = scalar_lea.hbm %s4137_s4, 2048 }
  0x3a   :  { %s40_s6 = sshll.u32 %s3520_s27, 4  ;;  %p3372_p10 = scmp.ne.s32.totalorder %s4137_s4, %s3371_s16  ;;  %s41_s6 = int_to_ptr.vmem [resolvable:$true] %s40_s6 }
  0x3b   :  { %p3375_p11 = scmp.lt.u32.totalorder %s3371_s16, %s4137_s4 }
  0x3d   :  { %p3377_p12 = pnand %p3375_p11, %p3372_p10 }
  0x3f   :  { %3380 = shalt.err (!%p3377_p12)
}
  0x40   :  { %s3381_s23 = scalar_lea.vmem %s41_s6, 2048  ;;  %p3386_p0 = scmp.lt.s32.totalorder %s41_s6, %s41_s6 }
  0x41   :  { %p3382_p13 = scmp.ne.s32.totalorder %s41_s6, %s3381_s23  ;;  %p3387_p1 = scmp.lt.s32.totalorder %s3381_s23, %s3381_s23 }
  0x43   :  { %p3388_p2 = por %p3387_p1, %p3386_p0 }
  0x45   :  { %p3389_p3 = pnand %p3388_p2, %p3382_p13 }
  0x47   :  { %3392 = shalt.err (!%p3389_p3)
}
  0x48   :  { %s3521_s11 = smov 64   ;;  %s3522_s21 = smov 4  }
  0x49   :  { %46 = dma.hbm_to_vmem [thread:$0]  %s4137_s4, 2048, %s41_s6, [#allocation3], %s3521_s11, %s3521_s11, %s3522_s21  }
  0x4a   :  { %s3523_s26 = smov [#allocation7]   ;;  %s3524_s18 = smov [#allocation10]  }
  0x4b   :  { %s67_s9 = sshll.u32 %s3523_s26, 4  ;;  %s88_s27 = sshll.u32 %s3524_s18, 4  ;;  %s68_s9 = int_to_ptr.vmem [resolvable:$true] %s67_s9  ;;  %s3664_s27 = int_to_ptr.vmem [resolvable:$true] %s88_s27 }
  0x4c   :  { %s3393_s16 = scalar_lea.hbm %s4140_s7, 32 }
  0x4d   :  { %p3394_p4 = scmp.ne.s32.totalorder %s4140_s7, %s3393_s16  ;;  %p3397_p5 = scmp.lt.u32.totalorder %s3393_s16, %s4140_s7 }
  0x4f   :  { %p3399_p6 = pnand %p3397_p5, %p3394_p4 }
  0x51   :  { %3402 = shalt.err (!%p3399_p6)
}
  0x52   :  { %s3403_s4 = scalar_lea.vmem %s68_s9, 32  ;;  %p3408_p8 = scmp.lt.s32.totalorder %s68_s9, %s68_s9 }
  0x53   :  { %p3404_p7 = scmp.ne.s32.totalorder %s68_s9, %s3403_s4  ;;  %p3409_p9 = scmp.lt.s32.totalorder %s3403_s4, %s3403_s4 }
  0x55   :  { %p3410_p10 = por %p3409_p9, %p3408_p8 }
  0x57   :  { %p3411_p11 = pnand %p3410_p10, %p3404_p7 }
  0x59   :  { %3414 = shalt.err (!%p3411_p11)
}
  0x5a   :  { %70 = dma.hbm_to_vmem [thread:$0]  %s4140_s7, 32, %s68_s9, [#allocation6]  }
  0x5b   :  { %s3415_s24 = scalar_lea.hbm %s4143_s10, 2048 }
  0x5c   :  { %p3416_p12 = scmp.ne.s32.totalorder %s4143_s10, %s3415_s24  ;;  %p3419_p13 = scmp.lt.u32.totalorder %s3415_s24, %s4143_s10 }
  0x5e   :  { %p3421_p0 = pnand %p3419_p13, %p3416_p12 }
  0x60   :  { %3424 = shalt.err (!%p3421_p0)
}
  0x61   :  { %s3425_s30 = scalar_lea.vmem %s3664_s27, 2048  ;;  %p3430_p2 = scmp.lt.s32.totalorder %s3664_s27, %s3664_s27 }
  0x62   :  { %p3426_p1 = scmp.ne.s32.totalorder %s3664_s27, %s3425_s30  ;;  %p3431_p3 = scmp.lt.s32.totalorder %s3425_s30, %s3425_s30 }
  0x64   :  { %p3432_p4 = por %p3431_p3, %p3430_p2 }
  0x66   :  { %p3433_p5 = pnand %p3432_p4, %p3426_p1 }
  0x68   :  { %3436 = shalt.err (!%p3433_p5)
}
  0x69   :  { %94 = dma.hbm_to_vmem [thread:$0]  %s4143_s10, 2048, %s3664_s27, [#allocation9], %s3516_s28, %s3516_s28, %s3517_s29  }
  0x6a   :  { %s3525_s16 = smov [#allocation13]   ;;  %s3437_s22 = scalar_lea.hbm %s4145_s12, 14336 }
  0x6b   :  { %s110_s17 = sshll.u32 %s3525_s16, 4  ;;  %p3438_p6 = scmp.ne.s32.totalorder %s4145_s12, %s3437_s22  ;;  %s111_s17 = int_to_ptr.vmem [resolvable:$true] %s110_s17 }
  0x6c   :  { %p3441_p7 = scmp.lt.u32.totalorder %s3437_s22, %s4145_s12 }
  0x6e   :  { %p3443_p8 = pnand %p3441_p7, %p3438_p6 }
  0x70   :  { %3446 = shalt.err (!%p3443_p8)
}
  0x71   :  { %s3447_s21 = scalar_lea.vmem %s111_s17, 14336  ;;  %p3452_p10 = scmp.lt.s32.totalorder %s111_s17, %s111_s17 }
  0x72   :  { %p3448_p9 = scmp.ne.s32.totalorder %s111_s17, %s3447_s21  ;;  %p3453_p11 = scmp.lt.s32.totalorder %s3447_s21, %s3447_s21 }
  0x74   :  { %p3454_p12 = por %p3453_p11, %p3452_p10 }
  0x76   :  { %p3455_p13 = pnand %p3454_p12, %p3448_p9 }
  0x78   :  { %3458 = shalt.err (!%p3455_p13)
}
  0x79   :  { %s3526_s10 = smov 448   ;;  %s3527_s28 = smov 28  }
  0x7a   :  { %116 = dma.hbm_to_vmem [thread:$0]  %s4145_s12, 14336, %s111_s17, [#allocation12], %s3526_s10, %s3526_s10, %s3527_s28  }
  0x7b   :  { %s3528_s24 = smov [#allocation14]   ;;  %s3459_s19 = scalar_lea.hbm %s4146_s13, 112 }
  0x7c   :  { %s123_s25 = sshll.u32 %s3528_s24, 4  ;;  %p3460_p0 = scmp.ne.s32.totalorder %s4146_s13, %s3459_s19  ;;  %s124_s25 = int_to_ptr.vmem [resolvable:$true] %s123_s25 }
  0x7d   :  { %p3463_p1 = scmp.lt.u32.totalorder %s3459_s19, %s4146_s13 }
  0x7f   :  { %p3465_p2 = pnand %p3463_p1, %p3460_p0 }
  0x81   :  { %3468 = shalt.err (!%p3465_p2)
}
  0x82   :  { %s3469_s20 = scalar_lea.vmem %s124_s25, 112  ;;  %s3473_s12 = scalar_lea.vmem %s124_s25, 128 }
  0x83   :  { %p3470_p3 = scmp.ne.s32.totalorder %s124_s25, %s3469_s20  ;;  %p3474_p4 = scmp.lt.s32.totalorder %s124_s25, %s124_s25 }
  0x84   :  { %p3475_p5 = scmp.lt.s32.totalorder %s3473_s12, %s3469_s20 }
  0x86   :  { %p3476_p6 = por %p3475_p5, %p3474_p4 }
  0x88   :  { %p3477_p7 = pnand %p3476_p6, %p3470_p3 }
  0x8a   :  { %3480 = shalt.err (!%p3477_p7)
}
  0x8b   :  { %126 = dma.hbm_to_vmem [thread:$0]  %s4146_s13, 112, %s124_s25, [#allocation15]  }
  0x8c   :  { %3503 = dma.done.wait [#allocation3], 2048  }
  0x8d   :  { %3504 = vsyncadd [#allocation3], 4294965248 }
  0x8e   :  { %3505 = dma.done.wait [#allocation6], 2080  }
  0x8f   :  { %3506 = vsyncadd [#allocation6], 4294965216 }
  0x90   :  { %3507 = dma.done.wait [#allocation9], 2064  }
  0x91   :  { %3508 = vsyncadd [#allocation9], 4294965232 }
  0x92   :  { %3509 = dma.done.wait [#allocation12], 14368  }
  0x93   :  { %3510 = vsyncadd [#allocation12], 4294952928 }
  0x94   :  { %3511 = dma.done.wait [#allocation15], 112  }
  0x95   :  { %3512 = vsyncadd [#allocation15], 4294967184  ;;  %v2896_v0 = vld [vmem:[%s4135_s2 + $0x4] ss:$8 sps:$4 sm:$0xff]   ;;  %v2898_v1 = vld [vmem:[%s4135_s2] ss:$8 sps:$4 sm:$0xff]  }
  0x96   :  { %770 = vmatprep.subr.bf16.mxu0 %v2896_v0  ;;  %v2899_v2 = vld [vmem:[%s4135_s2 + $0x14] ss:$8 sps:$4 sm:$0xff]   ;;  %v2901_v3 = vld [vmem:[%s4135_s2 + $0x10] ss:$8 sps:$4 sm:$0xff]   ;;  %v2902_v4 = vld [vmem:[%s4135_s2 + $0x24] ss:$8 sps:$4 sm:$0xff]  }
  0x97   :  { %771 = vmatpush1.bf16.msra.mxu0 %v2898_v1  ;;  %v2904_v5 = vld [vmem:[%s4135_s2 + $0x20] ss:$8 sps:$4 sm:$0xff]   ;;  %v2905_v6 = vld [vmem:[%s4135_s2 + $0x34] ss:$8 sps:$4 sm:$0xff]   ;;  %v2907_v7 = vld [vmem:[%s4135_s2 + $0x30] ss:$8 sps:$4 sm:$0xff]  }
  0x98   :  { %772 = vmatprep.subr.bf16.mxu0 %v2899_v2  ;;  %v2908_v8 = vld [vmem:[%s4135_s2 + $0x44] ss:$8 sps:$4 sm:$0xff]   ;;  %v2910_v9 = vld [vmem:[%s4135_s2 + $0x40] ss:$8 sps:$4 sm:$0xff]   ;;  %v2911_v10 = vld [vmem:[%s4135_s2 + $0x54] ss:$8 sps:$4 sm:$0xff]  }
  0x99   :  { %v2913_v11 = vld [vmem:[%s4135_s2 + $0x50] ss:$8 sps:$4 sm:$0xff]   ;;  %v2914_v12 = vld [vmem:[%s4135_s2 + $0x64] ss:$8 sps:$4 sm:$0xff]   ;;  %v2916_v15 = vld [vmem:[%s4135_s2 + $0x60] ss:$8 sps:$4 sm:$0xff]  }
  0x9a   :  { %v153_v13 = vld [vmem:[%s4133_s0 + $0x8] sm:$0xff]  ;;  %v2917_v16 = vld [vmem:[%s4135_s2 + $0x74] ss:$8 sps:$4 sm:$0xff]   ;;  %v2919_v17 = vld [vmem:[%s4135_s2 + $0x70] ss:$8 sps:$4 sm:$0xff]   ;;  %vm766_vm0 = vcmask 130048  }
  0x9b   :  { %773 = vmatpush1.bf16.msra.mxu0 %v2901_v3  ;;  %v160_v14 = vpack.c.bf16 %v153_v13, %v153_v13  ;;  %v2920_v18 = vld [vmem:[%s4135_s2 + $0x84] ss:$8 sps:$4 sm:$0xff]   ;;  %v2922_v19 = vld [vmem:[%s4135_s2 + $0x80] ss:$8 sps:$4 sm:$0xff]   ;;  %v2923_v20 = vld [vmem:[%s4135_s2 + $0x94] ss:$8 sps:$4 sm:$0xff]  }
  0x9c   :  { %774 = vmatprep.subr.bf16.mxu0 %v2902_v4  ;;  %v2925_v21 = vld [vmem:[%s4135_s2 + $0x90] ss:$8 sps:$4 sm:$0xff]   ;;  %v2926_v22 = vld [vmem:[%s4135_s2 + $0xa4] ss:$8 sps:$4 sm:$0xff]   ;;  %v2928_v23 = vld [vmem:[%s4135_s2 + $0xa0] ss:$8 sps:$4 sm:$0xff]  }
  0x9d   :  { %802 = vmatprep.mubr.bf16.mxu0 %v160_v14  ;;  %v2929_v24 = vld [vmem:[%s4135_s2 + $0xb4] ss:$8 sps:$4 sm:$0xff]   ;;  %v2931_v25 = vld [vmem:[%s4135_s2 + $0xb0] ss:$8 sps:$4 sm:$0xff]   ;;  %v2932_v26 = vld [vmem:[%s4135_s2 + $0xc4] ss:$8 sps:$4 sm:$0xff]  }
  0x9e   :  { %v2934_v27 = vld [vmem:[%s4135_s2 + $0xc0] ss:$8 sps:$4 sm:$0xff]   ;;  %v2935_v28 = vld [vmem:[%s4135_s2 + $0xd4] ss:$8 sps:$4 sm:$0xff]   ;;  %v2937_v29 = vld [vmem:[%s4135_s2 + $0xd0] ss:$8 sps:$4 sm:$0xff]  }
  0x9f   :  { %775 = vmatpush1.bf16.msra.mxu0 %v2904_v5  ;;  %v2938_v30 = vld [vmem:[%s4135_s2 + $0xe4] ss:$8 sps:$4 sm:$0xff]   ;;  %v2940_v31 = vld [vmem:[%s4135_s2 + $0xe0] ss:$8 sps:$4 sm:$0xff]   ;;  %v2941_v32 = vld [vmem:[%s4135_s2 + $0xf4] ss:$8 sps:$4 sm:$0xff]  }
  0xa0   :  { %776 = vmatprep.subr.bf16.mxu0 %v2905_v6  ;;  %v2943_v33 = vld [vmem:[%s4135_s2 + $0xf0] ss:$8 sps:$4 sm:$0xff]   ;;  %v2946_v34 = vld [vmem:[%s4135_s2 + $0x104] ss:$8 sps:$4 sm:$0xff]   ;;  %v2944_v38 = vld [vmem:[%s4135_s2 + $0x100] ss:$8 sps:$4 sm:$0xff]  }
  0xa1   :  { %v152_v35 = vld [vmem:[%s4133_s0] sm:$0xff]  ;;  %v155_v36 = vld [vmem:[%s4133_s0 + $0x18] sm:$0xff]  ;;  %v3045_v49 = vld [vmem:[#allocation2 + $0x48] sm:$0xff]   ;;  %vm3531_vm1 = vmmov 0  }
  0xa2   :  { %v159_v37 = vpack.c.bf16 %v152_v35, %v152_v35  ;;  %v162_v39 = vpack.c.bf16 %v155_v36, %v155_v36  ;;  %v2949_v40 = vld [vmem:[%s4135_s2 + $0x114] ss:$8 sps:$4 sm:$0xff]   ;;  %v2947_v41 = vld [vmem:[%s4135_s2 + $0x110] ss:$8 sps:$4 sm:$0xff]   ;;  %v2952_v42 = vld [vmem:[%s4135_s2 + $0x124] ss:$8 sps:$4 sm:$0xff]  }
  0xa3   :  { %777 = vmatpush1.bf16.msra.mxu0 %v2907_v7  ;;  %v2950_v43 = vld [vmem:[%s4135_s2 + $0x120] ss:$8 sps:$4 sm:$0xff]   ;;  %v2955_v44 = vld [vmem:[%s4135_s2 + $0x134] ss:$8 sps:$4 sm:$0xff]   ;;  %v2953_v45 = vld [vmem:[%s4135_s2 + $0x130] ss:$8 sps:$4 sm:$0xff]  }
  0xa4   :  { %778 = vmatprep.subr.bf16.mxu0 %v2908_v8  ;;  %v2958_v46 = vld [vmem:[%s4135_s2 + $0x144] ss:$8 sps:$4 sm:$0xff]   ;;  %v2956_v50 = vld [vmem:[%s4135_s2 + $0x140] ss:$8 sps:$4 sm:$0xff]   ;;  %v2961_v51 = vld [vmem:[%s4135_s2 + $0x154] ss:$8 sps:$4 sm:$0xff]  }
  0xa5   :  { %v3043_v47 = vld [vmem:[#allocation2 + $0x40] sm:$0xff]   ;;  %v2959_v52 = vld [vmem:[%s4135_s2 + $0x150] ss:$8 sps:$4 sm:$0xff]   ;;  %v3046_v53 = vld [vmem:[#allocation2 + $0x8] sm:$0xff]  }
  0xa6   :  { %v3044_v48 = vld [vmem:[#allocation2] sm:$0xff]   ;;  %2791 = vmatprep.subr.bf16.mxu1 %v3043_v47  ;;  %v3047_v55 = vld [vmem:[#allocation2 + $0x50] sm:$0xff]   ;;  %v3049_v57 = vld [vmem:[#allocation2 + $0x58] sm:$0xff]  }
  0xa7   :  { %779 = vmatpush1.bf16.msra.mxu0 %v2910_v9  ;;  %2792 = vmatpush3.bf16.msra.mxu1 %v3044_v48  ;;  %v2964_v54 = vld [vmem:[%s4135_s2 + $0x164] ss:$8 sps:$4 sm:$0xff]   ;;  %v3048_v56 = vld [vmem:[#allocation2 + $0x10] sm:$0xff]   ;;  %v2962_v58 = vld [vmem:[%s4135_s2 + $0x160] ss:$8 sps:$4 sm:$0xff]  }
  0xa8   :  { %780 = vmatprep.subr.bf16.mxu0 %v2911_v10  ;;  %2793 = vmatprep.subr.bf16.mxu1 %v3045_v49  ;;  %v2967_v59 = vld [vmem:[%s4135_s2 + $0x174] ss:$8 sps:$4 sm:$0xff]   ;;  %v3051_v61 = vld [vmem:[#allocation2 + $0x60] sm:$0xff]   ;;  %v2965_v62 = vld [vmem:[%s4135_s2 + $0x170] ss:$8 sps:$4 sm:$0xff]  }
  0xa9   :  { %v3050_v60 = vld [vmem:[#allocation2 + $0x18] sm:$0xff]   ;;  %v2970_v63 = vld [vmem:[%s4135_s2 + $0x184] ss:$8 sps:$4 sm:$0xff]   ;;  %v2968_v2 = vld [vmem:[%s4135_s2 + $0x180] ss:$8 sps:$4 sm:$0xff]  }
  0xaa   :  { %v3052_v0 = vld [vmem:[#allocation2 + $0x20] sm:$0xff]   ;;  %v3053_v1 = vld [vmem:[#allocation2 + $0x68] sm:$0xff]   ;;  %v2973_v3 = vld [vmem:[%s4135_s2 + $0x194] ss:$8 sps:$4 sm:$0xff]  }
  0xab   :  { %781 = vmatpush1.bf16.msra.mxu0 %v2913_v11  ;;  %2794 = vmatpush3.bf16.msra.mxu1 %v3046_v53  ;;  %v3054_v4 = vld [vmem:[#allocation2 + $0x28] sm:$0xff]   ;;  %v2971_v5 = vld [vmem:[%s4135_s2 + $0x190] ss:$8 sps:$4 sm:$0xff]   ;;  %v2979_v8 = vld [vmem:[%s4135_s2 + $0x1b4] ss:$8 sps:$4 sm:$0xff]  }
  0xac   :  { %782 = vmatprep.subr.bf16.mxu0 %v2914_v12  ;;  %2795 = vmatprep.subr.bf16.mxu1 %v3047_v55  ;;  %v2976_v6 = vld [vmem:[%s4135_s2 + $0x1a4] ss:$8 sps:$4 sm:$0xff]   ;;  %v2974_v7 = vld [vmem:[%s4135_s2 + $0x1a0] ss:$8 sps:$4 sm:$0xff]   ;;  %v2977_v9 = vld [vmem:[%s4135_s2 + $0x1b0] ss:$8 sps:$4 sm:$0xff]  }
  0xad   :  { %v2982_v10 = vld [vmem:[%s4135_s2 + $0x1c4] ss:$8 sps:$4 sm:$0xff]   ;;  %v2980_v11 = vld [vmem:[%s4135_s2 + $0x1c0] ss:$8 sps:$4 sm:$0xff]   ;;  %v2985_v12 = vld [vmem:[%s4135_s2 + $0x1d4] ss:$8 sps:$4 sm:$0xff]  }
  0xae   :  { %v2983_v13 = vld [vmem:[%s4135_s2 + $0x1d0] ss:$8 sps:$4 sm:$0xff]   ;;  %v2988_v14 = vld [vmem:[%s4135_s2 + $0x1e4] ss:$8 sps:$4 sm:$0xff]   ;;  %v3010_v35 = vld [vmem:[%s4135_s2 + $0x260] ss:$8 sps:$4 sm:$0xff]  }
  0xaf   :  { %783 = vmatpush1.bf16.msra.mxu0 %v2916_v15  ;;  %2796 = vmatpush3.bf16.msra.mxu1 %v3048_v56  ;;  %v2986_v15 = vld [vmem:[%s4135_s2 + $0x1e0] ss:$8 sps:$4 sm:$0xff]   ;;  %v3015_v36 = vld [vmem:[%s4135_s2 + $0x274] ss:$8 sps:$4 sm:$0xff]   ;;  %v3031_v49 = vld [vmem:[%s4135_s2 + $0x2d0] ss:$8 sps:$4 sm:$0xff]  }
  0xb0   :  { %784 = vmatprep.subr.bf16.mxu0 %v2917_v16  ;;  %2797 = vmatprep.subr.bf16.mxu1 %v3049_v57  ;;  %v2991_v16 = vld [vmem:[%s4135_s2 + $0x1f4] ss:$8 sps:$4 sm:$0xff]   ;;  %v3028_v47 = vld [vmem:[%s4135_s2 + $0x2c0] ss:$8 sps:$4 sm:$0xff]   ;;  %v3037_v53 = vld [vmem:[%s4135_s2 + $0x2f0] ss:$8 sps:$4 sm:$0xff]  }
  0xb1   :  { %v3033_v48 = vld [vmem:[%s4135_s2 + $0x2d4] ss:$8 sps:$4 sm:$0xff]   ;;  %v3042_v55 = vld [vmem:[%s4135_s2 + $0x304] ss:$8 sps:$4 sm:$0xff]   ;;  %v3040_v57 = vld [vmem:[%s4135_s2 + $0x300] ss:$8 sps:$4 sm:$0xff]  }
  0xb3   :  { %785 = vmatpush1.bf16.msra.mxu0 %v2919_v17  ;;  %2798 = vmatpush3.bf16.msra.mxu1 %v3050_v60  ;;  %v2989_v17 = vld [vmem:[%s4135_s2 + $0x1f0] ss:$8 sps:$4 sm:$0xff]  }
  0xb4   :  { %786 = vmatprep.subr.bf16.mxu0 %v2920_v18  ;;  %2799 = vmatprep.subr.bf16.mxu1 %v3051_v61  ;;  %v154_v18 = vld [vmem:[%s4133_s0 + $0x10] sm:$0xff] }
  0xb5   :  { %v3055_v61 = vld [vmem:[#allocation2 + $0x70] sm:$0xff]  }
  0xb7   :  { %787 = vmatpush1.bf16.msra.mxu0 %v2922_v19  ;;  %2800 = vmatpush3.bf16.msra.mxu1 %v3052_v0  ;;  %v2994_v19 = vld [vmem:[%s4135_s2 + $0x204] ss:$8 sps:$4 sm:$0xff]   ;;  %v3058_v0 = vld [vmem:[#allocation2 + $0x38] sm:$0xff]  }
  0xb8   :  { %788 = vmatprep.subr.bf16.mxu0 %v2923_v20  ;;  %2801 = vmatprep.subr.bf16.mxu1 %v3053_v1  ;;  %v157_v20 = vld [vmem:[%s4133_s0 + $0x28] sm:$0xff] }
  0xb9   :  { %v3061_v1 = vld [vmem:[#allocation5 + $0x4] ss:$8 sps:$4 sm:$0xff]  }
  0xbb   :  { %789 = vmatpush1.bf16.msra.mxu0 %v2925_v21  ;;  %2802 = vmatpush3.bf16.msra.mxu1 %v3054_v4  ;;  %v2992_v21 = vld [vmem:[%s4135_s2 + $0x200] ss:$8 sps:$4 sm:$0xff]  }
  0xbc   :  { %790 = vmatprep.subr.bf16.mxu0 %v2926_v22  ;;  %v161_v22 = vpack.c.bf16 %v154_v18, %v154_v18  ;;  %2803 = vmatprep.subr.bf16.mxu1 %v3055_v61  ;;  %v3059_v18 = vld [vmem:[#allocation5] ss:$8 sps:$4 sm:$0xff]  }
  0xbf   :  { %791 = vmatpush1.bf16.msra.mxu0 %v2928_v23  ;;  %v2997_v23 = vld [vmem:[%s4135_s2 + $0x214] ss:$8 sps:$4 sm:$0xff]  }
  0xc0   :  { %792 = vmatprep.subr.bf16.mxu0 %v2929_v24  ;;  %v164_v24 = vpack.c.bf16 %v157_v20, %v157_v20  ;;  %v3064_v20 = vld [vmem:[#allocation5 + $0x14] ss:$8 sps:$4 sm:$0xff]  }
  0xc3   :  { %793 = vmatpush1.bf16.msra.mxu0 %v2931_v25  ;;  %v2995_v25 = vld [vmem:[%s4135_s2 + $0x210] ss:$8 sps:$4 sm:$0xff]  }
  0xc4   :  { %794 = vmatprep.subr.bf16.mxu0 %v2932_v26  ;;  %v3000_v26 = vld [vmem:[%s4135_s2 + $0x224] ss:$8 sps:$4 sm:$0xff]  }
  0xc7   :  { %795 = vmatpush1.bf16.msra.mxu0 %v2934_v27  ;;  %v2998_v27 = vld [vmem:[%s4135_s2 + $0x220] ss:$8 sps:$4 sm:$0xff]  }
  0xc8   :  { %796 = vmatprep.subr.bf16.mxu0 %v2935_v28  ;;  %v3003_v28 = vld [vmem:[%s4135_s2 + $0x234] ss:$8 sps:$4 sm:$0xff]  }
  0xcb   :  { %797 = vmatpush1.bf16.msra.mxu0 %v2937_v29  ;;  %v3001_v29 = vld [vmem:[%s4135_s2 + $0x230] ss:$8 sps:$4 sm:$0xff]  }
  0xcc   :  { %798 = vmatprep.subr.bf16.mxu0 %v2938_v30  ;;  %v3006_v30 = vld [vmem:[%s4135_s2 + $0x244] ss:$8 sps:$4 sm:$0xff]  }
  0xcf   :  { %799 = vmatpush1.bf16.msra.mxu0 %v2940_v31  ;;  %v3004_v31 = vld [vmem:[%s4135_s2 + $0x240] ss:$8 sps:$4 sm:$0xff]  }
  0xd0   :  { %800 = vmatprep.subr.bf16.mxu0 %v2941_v32  ;;  %v3009_v32 = vld [vmem:[%s4135_s2 + $0x254] ss:$8 sps:$4 sm:$0xff]  }
  0xd3   :  { %801 = vmatpush1.bf16.msra.mxu0 %v2943_v33  ;;  %v3007_v33 = vld [vmem:[%s4135_s2 + $0x250] ss:$8 sps:$4 sm:$0xff]  }
  0xd4   :  { %811 = vmatprep.subr.bf16.mxu0 %v2946_v34  ;;  %v3012_v34 = vld [vmem:[%s4135_s2 + $0x264] ss:$8 sps:$4 sm:$0xff]  }
  0xd6   :  { %803 = vmatmul.mubr.bf16.vlgmr.msra.gmra.mrb[0].mxu0 %v159_v37  ;;  %v3013_v37 = vld [vmem:[%s4135_s2 + $0x270] ss:$8 sps:$4 sm:$0xff]  }
  0xd7   :  { %812 = vmatpush1.bf16.msra.mxu0 %v2944_v38  ;;  %843 = vmatprep.mubr.bf16.mxu0 %v162_v39  ;;  %v3018_v38 = vld [vmem:[%s4135_s2 + $0x284] ss:$8 sps:$4 sm:$0xff]   ;;  %v3016_v39 = vld [vmem:[%s4135_s2 + $0x280] ss:$8 sps:$4 sm:$0xff]  }
  0xd8   :  { %813 = vmatprep.subr.bf16.mxu0 %v2949_v40  ;;  %v3021_v40 = vld [vmem:[%s4135_s2 + $0x294] ss:$8 sps:$4 sm:$0xff]  }
  0xdb   :  { %814 = vmatpush1.bf16.msra.mxu0 %v2947_v41  ;;  %v3019_v41 = vld [vmem:[%s4135_s2 + $0x290] ss:$8 sps:$4 sm:$0xff]  }
  0xdc   :  { %815 = vmatprep.subr.bf16.mxu0 %v2952_v42  ;;  %v3024_v42 = vld [vmem:[%s4135_s2 + $0x2a4] ss:$8 sps:$4 sm:$0xff]  }
  0xdf   :  { %816 = vmatpush1.bf16.msra.mxu0 %v2950_v43  ;;  %v3022_v43 = vld [vmem:[%s4135_s2 + $0x2a0] ss:$8 sps:$4 sm:$0xff]  }
  0xe0   :  { %817 = vmatprep.subr.bf16.mxu0 %v2955_v44  ;;  %v3027_v44 = vld [vmem:[%s4135_s2 + $0x2b4] ss:$8 sps:$4 sm:$0xff]  }
  0xe3   :  { %818 = vmatpush1.bf16.msra.mxu0 %v2953_v45  ;;  %v3025_v45 = vld [vmem:[%s4135_s2 + $0x2b0] ss:$8 sps:$4 sm:$0xff]  }
  0xe4   :  { %819 = vmatprep.subr.bf16.mxu0 %v2958_v46  ;;  %v3030_v46 = vld [vmem:[%s4135_s2 + $0x2c4] ss:$8 sps:$4 sm:$0xff]  }
  0xe7   :  { %820 = vmatpush1.bf16.msra.mxu0 %v2956_v50  ;;  %v3036_v50 = vld [vmem:[%s4135_s2 + $0x2e4] ss:$8 sps:$4 sm:$0xff]  }
  0xe8   :  { %821 = vmatprep.subr.bf16.mxu0 %v2961_v51  ;;  %v3034_v51 = vld [vmem:[%s4135_s2 + $0x2e0] ss:$8 sps:$4 sm:$0xff]  }
  0xeb   :  { %822 = vmatpush1.bf16.msra.mxu0 %v2959_v52  ;;  %v3039_v52 = vld [vmem:[%s4135_s2 + $0x2f4] ss:$8 sps:$4 sm:$0xff]  }
  0xec   :  { %823 = vmatprep.subr.bf16.mxu0 %v2964_v54  ;;  %v156_v54 = vld [vmem:[%s4133_s0 + $0x20] sm:$0xff] }
  0xed   :  { %v163_v56 = vpack.c.bf16 %v156_v54, %v156_v54 }
  0xef   :  { %824 = vmatpush1.bf16.msra.mxu0 %v2962_v58  ;;  %v3529_v58 = vmov 0  }
  0xf0   :  { %825 = vmatprep.subr.bf16.mxu0 %v2967_v59  ;;  %v158_v59 = vld [vmem:[%s4133_s0 + $0x30] sm:$0xff] }
  0xf1   :  { %v165_v60 = vpack.c.bf16 %v158_v59, %v158_v59 }
  0xf3   :  { %826 = vmatpush1.bf16.msra.mxu0 %v2965_v62  ;;  %v3056_v62 = vld [vmem:[#allocation2 + $0x30] sm:$0xff]  }
  0xf4   :  { %827 = vmatprep.subr.bf16.mxu0 %v2970_v63  ;;  %2804 = vmatpush3.bf16.msra.mxu1 %v3056_v62  ;;  %v3057_v63 = vld [vmem:[#allocation2 + $0x78] sm:$0xff]  }
  0xf5   :  { %2805 = vmatprep.subr.bf16.mxu1 %v3057_v63 }
  0xf7   :  { %828 = vmatpush1.bf16.msra.mxu0 %v2968_v2  ;;  %v266_v2 = vlaneseq }
  0xf8   :  { %829 = vmatprep.subr.bf16.mxu0 %v2973_v3  ;;  %2806 = vmatpush3.bf16.msra.mxu1 %v3058_v0 }
  0xf9   :  { %1223 = vmatprep.subr.bf16.mxu1 %v3061_v1  ;;  %v4038_v3 = vshrl.u32 %v266_v2, 7  ;;  %v1264_v1 = vld [vmem:[%s4134_s1] sm:$0xff]  ;;  %s3532_s1 = smov [#allocation16]  }
  0xfb   :  { %830 = vmatpush1.bf16.msra.mxu0 %v2971_v5  ;;  %v4041_v4 = vsub.s32 0, %v4038_v3  ;;  %v264_v5 = vld [vmem:[%s4136_s3] sm:$0x3] }
  0xfc   :  { %831 = vmatprep.subr.bf16.mxu0 %v2976_v6  ;;  %v4047_v6 = vsub.s32 1, %v4038_v3 }
  0xff   :  { %832 = vmatpush1.bf16.msra.mxu0 %v2974_v7  ;;  %v269_v7 = vrot.slane %v264_v5, %v4041_v4 }
 0x100   :  { %833 = vmatprep.subr.bf16.mxu0 %v2979_v8  ;;  %v273_v8 = vrot.slane %v264_v5, %v4047_v6 }
 0x103   :  { %834 = vmatpush1.bf16.msra.mxu0 %v2977_v9 }
 0x104   :  { %835 = vmatprep.subr.bf16.mxu0 %v2982_v10 }
 0x107   :  { %836 = vmatpush1.bf16.msra.mxu0 %v2980_v11 }
 0x108   :  { %837 = vmatprep.subr.bf16.mxu0 %v2985_v12 }
 0x10b   :  { %838 = vmatpush1.bf16.msra.mxu0 %v2983_v13 }
 0x10c   :  { %839 = vmatprep.subr.bf16.mxu0 %v2988_v14 }
 0x10f   :  { %840 = vmatpush1.bf16.msra.mxu0 %v2986_v15 }
 0x110   :  { %841 = vmatprep.subr.bf16.mxu0 %v2991_v16 }
 0x113   :  { %842 = vmatpush1.bf16.msra.mxu0 %v2989_v17 }
 0x114   :  { %852 = vmatprep.subr.bf16.mxu0 %v2994_v19 }
 0x116   :  { %844 = vmatmul.mubr.bf16.vlgmr.msra.gmra.mrb[0].mxu0 %v161_v22  ;;  %v3067_v22 = vld [vmem:[#allocation5 + $0x24] ss:$8 sps:$4 sm:$0xff]  }
 0x117   :  { %853 = vmatpush1.bf16.msra.mxu0 %v2992_v21  ;;  %884 = vmatprep.mubr.bf16.mxu0 %v164_v24  ;;  %v3062_v21 = vld [vmem:[#allocation5 + $0x10] ss:$8 sps:$4 sm:$0xff]   ;;  %v3070_v24 = vld [vmem:[#allocation5 + $0x34] ss:$8 sps:$4 sm:$0xff]  }
 0x118   :  { %854 = vmatprep.subr.bf16.mxu0 %v2997_v23  ;;  %v3065_v23 = vld [vmem:[#allocation5 + $0x20] ss:$8 sps:$4 sm:$0xff]  }
 0x11b   :  { %855 = vmatpush1.bf16.msra.mxu0 %v2995_v25  ;;  %v3068_v25 = vld [vmem:[#allocation5 + $0x30] ss:$8 sps:$4 sm:$0xff]  }
 0x11c   :  { %856 = vmatprep.subr.bf16.mxu0 %v3000_v26  ;;  %v3073_v26 = vld [vmem:[#allocation5 + $0x44] ss:$8 sps:$4 sm:$0xff]  }
 0x11f   :  { %857 = vmatpush1.bf16.msra.mxu0 %v2998_v27  ;;  %v3071_v27 = vld [vmem:[#allocation5 + $0x40] ss:$8 sps:$4 sm:$0xff]  }
 0x120   :  { %858 = vmatprep.subr.bf16.mxu0 %v3003_v28  ;;  %v3076_v28 = vld [vmem:[#allocation5 + $0x54] ss:$8 sps:$4 sm:$0xff]  }
 0x123   :  { %859 = vmatpush1.bf16.msra.mxu0 %v3001_v29  ;;  %v3074_v29 = vld [vmem:[#allocation5 + $0x50] ss:$8 sps:$4 sm:$0xff]  }
 0x124   :  { %860 = vmatprep.subr.bf16.mxu0 %v3006_v30  ;;  %v3079_v30 = vld [vmem:[#allocation5 + $0x64] ss:$8 sps:$4 sm:$0xff]  }
 0x127   :  { %861 = vmatpush1.bf16.msra.mxu0 %v3004_v31  ;;  %v3077_v31 = vld [vmem:[#allocation5 + $0x60] ss:$8 sps:$4 sm:$0xff]  }
 0x128   :  { %862 = vmatprep.subr.bf16.mxu0 %v3009_v32  ;;  %v3082_v32 = vld [vmem:[#allocation5 + $0x74] ss:$8 sps:$4 sm:$0xff]  }
 0x12b   :  { %863 = vmatpush1.bf16.msra.mxu0 %v3007_v33  ;;  %v3080_v33 = vld [vmem:[#allocation5 + $0x70] ss:$8 sps:$4 sm:$0xff]  }
 0x12c   :  { %864 = vmatprep.subr.bf16.mxu0 %v3012_v34  ;;  %v3530_v34 = vmov 0.0  }
 0x12f   :  { %865 = vmatpush1.bf16.msra.mxu0 %v3010_v35 }
 0x130   :  { %866 = vmatprep.subr.bf16.mxu0 %v3015_v36  ;;  %v2614_v36 = vld [vmem:[%s4138_s5] ss:$0 sm:$0xff] }
 0x133   :  { %867 = vmatpush1.bf16.msra.mxu0 %v3013_v37 }
 0x134   :  { %868 = vmatprep.subr.bf16.mxu0 %v3018_v38 }
 0x137   :  { %869 = vmatpush1.bf16.msra.mxu0 %v3016_v39 }
 0x138   :  { %870 = vmatprep.subr.bf16.mxu0 %v3021_v40 }
 0x13b   :  { %871 = vmatpush1.bf16.msra.mxu0 %v3019_v41 }
 0x13c   :  { %872 = vmatprep.subr.bf16.mxu0 %v3024_v42 }
 0x13f   :  { %873 = vmatpush1.bf16.msra.mxu0 %v3022_v43  ;;  %v3083_v43 = vld [vmem:[%s4141_s8] sm:$0xff]  }
 0x140   :  { %874 = vmatprep.subr.bf16.mxu0 %v3027_v44 }
 0x143   :  { %875 = vmatpush1.bf16.msra.mxu0 %v3025_v45  ;;  %v3084_v45 = vld [vmem:[%s4141_s8 + $0x8] sm:$0xff]  }
 0x144   :  { %876 = vmatprep.subr.bf16.mxu0 %v3030_v46  ;;  %v3085_v46 = vld [vmem:[%s4141_s8 + $0x10] sm:$0xff]  }
 0x147   :  { %877 = vmatpush1.bf16.msra.mxu0 %v3028_v47  ;;  %v3086_v47 = vld [vmem:[%s4141_s8 + $0x18] sm:$0xff]  }
 0x148   :  { %878 = vmatprep.subr.bf16.mxu0 %v3033_v48  ;;  %v3087_v48 = vld [vmem:[%s4141_s8 + $0x20] sm:$0xff]  }
 0x14b   :  { %879 = vmatpush1.bf16.msra.mxu0 %v3031_v49  ;;  %v3088_v49 = vld [vmem:[%s4141_s8 + $0x28] sm:$0xff]  }
 0x14c   :  { %880 = vmatprep.subr.bf16.mxu0 %v3036_v50  ;;  %v3089_v50 = vld [vmem:[%s4141_s8 + $0x30] sm:$0xff]  }
 0x14f   :  { %881 = vmatpush1.bf16.msra.mxu0 %v3034_v51  ;;  %v3090_v51 = vld [vmem:[%s4141_s8 + $0x38] sm:$0xff]  }
 0x150   :  { %882 = vmatprep.subr.bf16.mxu0 %v3039_v52  ;;  %v3093_v52 = vld [vmem:[#allocation10 + $0x4] ss:$8 sps:$4 sm:$0xff]  }
 0x153   :  { %883 = vmatpush1.bf16.msra.mxu0 %v3037_v53  ;;  %v1131_v53 = vld [vmem:[#allocation7] sm:$0x3] }
 0x154   :  { %893 = vmatprep.subr.bf16.mxu0 %v3042_v55  ;;  %v1136_v54 = vrot.slane %v1131_v53, %v4041_v4  ;;  %v1140_v55 = vrot.slane %v1131_v53, %v4047_v6 }
 0x156   :  { %885 = vmatmul.mubr.bf16.vlgmr.msra.gmra.mrb[0].mxu0 %v163_v56 }
 0x157   :  { %894 = vmatpush1.bf16.msra.mxu0 %v3040_v57  ;;  %925 = vmatprep.mubr.bf16.mxu0 %v3529_v58 }
 0x162   :  { %2613 = vmatmul.mubr.msk.bf16.vlgmr.msra.gmra.mrb[0].mxu0 %vm766_vm0, %v165_v60 }
 0x235   :  { %v927_v9 = vpop.f32.mrb[0].mxu0 }
 0x236   :  { %v2864_v10 = vadd.f32 %v927_v9, %v269_v7  ;;  %v929_v11 = vpop.f32.mrb[1].mxu0 }
 0x237   :  { %v2865_v12 = vadd.f32 %v929_v11, %v273_v8  ;;  %v931_v13 = vpop.f32.mrb[2].mxu0  ;;  %v3091_v8 = vld [vmem:[#allocation10] ss:$8 sps:$4 sm:$0xff]   ;;  %v3094_v11 = vld [vmem:[#allocation10 + $0x10] ss:$8 sps:$4 sm:$0xff]  }
 0x238   :  { %v934_v14 = vmax.f32 %v2864_v10, 0.0  ;;  %v932_v15 = vpop.f32.mrb[3].mxu0  ;;  %v3096_v10 = vld [vmem:[#allocation10 + $0x14] ss:$8 sps:$4 sm:$0xff]   ;;  %v3097_v13 = vld [vmem:[#allocation10 + $0x20] ss:$8 sps:$4 sm:$0xff]  }
 0x239   :  { %v935_v16 = vmax.f32 %v2865_v12, 0.0  ;;  %v3099_v12 = vld [vmem:[#allocation10 + $0x24] ss:$8 sps:$4 sm:$0xff]   ;;  %v3100_v15 = vld [vmem:[#allocation10 + $0x30] ss:$8 sps:$4 sm:$0xff]  }
 0x23a   :  { %v936_v19 = vpack.c.bf16 %v934_v14, %v934_v14  ;;  %v3102_v14 = vld [vmem:[#allocation10 + $0x34] ss:$8 sps:$4 sm:$0xff]  }
 0x23b   :  { %v937_v17 = vpack.c.bf16 %v935_v16, %v935_v16  ;;  %v3105_v16 = vld [vmem:[#allocation10 + $0x44] ss:$8 sps:$4 sm:$0xff]  }
 0x23d   :  { %1105 = vmatprep.mubr.bf16.mxu1 %v937_v17  ;;  %v3103_v17 = vld [vmem:[#allocation10 + $0x40] ss:$8 sps:$4 sm:$0xff]  }
 0x23e   :  { %1106 = vmatmul.mubr.bf16.vlgmr.msra.gmra.mrb[0].mxu1 %v936_v19  ;;  %v3106_v19 = vld [vmem:[#allocation10 + $0x50] ss:$8 sps:$4 sm:$0xff]  }
 0x23f   :  { %1224 = vmatpush1.bf16.msra.mxu1 %v3059_v18  ;;  %1255 = vmatprep.mubr.bf16.mxu1 %v3529_v58  ;;  %v3108_v18 = vld [vmem:[#allocation10 + $0x54] ss:$8 sps:$4 sm:$0xff]  }
 0x240   :  { %1225 = vmatprep.subr.bf16.mxu1 %v3064_v20  ;;  %v3111_v20 = vld [vmem:[#allocation10 + $0x64] ss:$8 sps:$4 sm:$0xff]  }
 0x243   :  { %1226 = vmatpush1.bf16.msra.mxu1 %v3062_v21  ;;  %v3114_v21 = vld [vmem:[#allocation10 + $0x74] ss:$8 sps:$4 sm:$0xff]  }
 0x244   :  { %1227 = vmatprep.subr.bf16.mxu1 %v3067_v22  ;;  %v3112_v22 = vld [vmem:[#allocation10 + $0x70] ss:$8 sps:$4 sm:$0xff]  }
 0x247   :  { %1228 = vmatpush1.bf16.msra.mxu1 %v3065_v23  ;;  %v3117_v23 = vld [vmem:[#allocation13 + $0x4] ss:$28 sps:$4 sm:$0xff]  }
 0x248   :  { %1229 = vmatprep.subr.bf16.mxu1 %v3070_v24  ;;  %v3118_v24 = vld [vmem:[#allocation13 + $0x10] ss:$28 sps:$4 sm:$0xff]  }
 0x24b   :  { %1230 = vmatpush1.bf16.msra.mxu1 %v3068_v25  ;;  %v3120_v25 = vld [vmem:[#allocation13 + $0x14] ss:$28 sps:$4 sm:$0xff]  }
 0x24c   :  { %1231 = vmatprep.subr.bf16.mxu1 %v3073_v26  ;;  %2360 = vmatprep.subr.bf16.mxu0 %v3120_v25  ;;  %v3124_v26 = vld [vmem:[#allocation13 + $0x48] ss:$28 sps:$4 sm:$0xff]   ;;  %v3193_v25 = vld [vmem:[#allocation13 + $0x2d8] ss:$28 sps:$4 sm:$0xff]  }
 0x24d   :  { %2361 = vmatpush1.bf16.msra.mxu0 %v3118_v24  ;;  %v3195_v24 = vld [vmem:[#allocation13 + $0x2dc] ss:$28 sps:$4 sm:$0xff]  }
 0x24f   :  { %1232 = vmatpush1.bf16.msra.mxu1 %v3071_v27  ;;  %v3126_v27 = vld [vmem:[#allocation13 + $0x4c] ss:$28 sps:$4 sm:$0xff]  }
 0x250   :  { %1233 = vmatprep.subr.bf16.mxu1 %v3076_v28  ;;  %2362 = vmatprep.subr.bf16.mxu0 %v3126_v27  ;;  %v3130_v28 = vld [vmem:[#allocation13 + $0x80] ss:$28 sps:$4 sm:$0xff]   ;;  %v3199_v27 = vld [vmem:[#allocation13 + $0x310] ss:$28 sps:$4 sm:$0xff]  }
 0x251   :  { %2363 = vmatpush1.bf16.msra.mxu0 %v3124_v26  ;;  %v3201_v26 = vld [vmem:[#allocation13 + $0x314] ss:$28 sps:$4 sm:$0xff]  }
 0x253   :  { %1234 = vmatpush1.bf16.msra.mxu1 %v3074_v29  ;;  %v3132_v29 = vld [vmem:[#allocation13 + $0x84] ss:$28 sps:$4 sm:$0xff]  }
 0x254   :  { %1235 = vmatprep.subr.bf16.mxu1 %v3079_v30  ;;  %2364 = vmatprep.subr.bf16.mxu0 %v3132_v29  ;;  %v3136_v30 = vld [vmem:[#allocation13 + $0xb8] ss:$28 sps:$4 sm:$0xff]   ;;  %v3202_v29 = vld [vmem:[#allocation13 + $0x320] ss:$28 sps:$4 sm:$0xff]  }
 0x255   :  { %2365 = vmatpush1.bf16.msra.mxu0 %v3130_v28  ;;  %v3204_v28 = vld [vmem:[#allocation13 + $0x324] ss:$28 sps:$4 sm:$0xff]  }
 0x257   :  { %1236 = vmatpush1.bf16.msra.mxu1 %v3077_v31  ;;  %v3138_v31 = vld [vmem:[#allocation13 + $0xbc] ss:$28 sps:$4 sm:$0xff]  }
 0x258   :  { %1237 = vmatprep.subr.bf16.mxu1 %v3082_v32  ;;  %2366 = vmatprep.subr.bf16.mxu0 %v3138_v31  ;;  %v3142_v32 = vld [vmem:[#allocation13 + $0xf0] ss:$28 sps:$4 sm:$0xff]   ;;  %v3205_v31 = vld [vmem:[#allocation13 + $0x348] ss:$28 sps:$4 sm:$0xff]  }
 0x259   :  { %2367 = vmatpush1.bf16.msra.mxu0 %v3136_v30  ;;  %v3207_v30 = vld [vmem:[#allocation13 + $0x34c] ss:$28 sps:$4 sm:$0xff]  }
 0x25b   :  { %1238 = vmatpush1.bf16.msra.mxu1 %v3080_v33  ;;  %v3144_v33 = vld [vmem:[#allocation13 + $0xf4] ss:$28 sps:$4 sm:$0xff]  }
 0x25c   :  { %2844 = vmatprep.subr.bf16.mxu1 %v3530_v34  ;;  %2368 = vmatprep.subr.bf16.mxu0 %v3144_v33  ;;  %v3208_v33 = vld [vmem:[#allocation13 + $0x358] ss:$28 sps:$4 sm:$0xff]  }
 0x25d   :  { %2369 = vmatpush1.bf16.msra.mxu0 %v3142_v32  ;;  %v3210_v32 = vld [vmem:[#allocation13 + $0x35c] ss:$28 sps:$4 sm:$0xff]  }
 0x311   :  { %v2807_v35 = vpop.f32.mrb[0].mxu1 }
 0x312   :  { %v2808_v37 = vpop.f32.mrb[1].mxu1 }
 0x313   :  { %v2809_v38 = vadd.f32 %v2808_v37, %v2807_v35  ;;  %v2810_v39 = vpop.f32.mrb[2].mxu1  ;;  %v3150_v35 = vld [vmem:[#allocation13 + $0x12c] ss:$28 sps:$4 sm:$0xff]   ;;  %v3156_v37 = vld [vmem:[#allocation13 + $0x164] ss:$28 sps:$4 sm:$0xff]  }
 0x314   :  { %v2811_v40 = vpop.f32.mrb[3].mxu1  ;;  %2370 = vmatprep.subr.bf16.mxu0 %v3150_v35  ;;  %v3162_v39 = vld [vmem:[#allocation13 + $0x19c] ss:$28 sps:$4 sm:$0xff]  }
 0x315   :  { %v1108_v41 = vadd.f32 %v2809_v38, %v2614_v36  ;;  %v3154_v36 = vld [vmem:[#allocation13 + $0x160] ss:$28 sps:$4 sm:$0xff]   ;;  %v3160_v38 = vld [vmem:[#allocation13 + $0x198] ss:$28 sps:$4 sm:$0xff]   ;;  %v3166_v40 = vld [vmem:[#allocation13 + $0x1d0] ss:$28 sps:$4 sm:$0xff]  }
 0x316   :  { %v1400_v35 = vld [vmem:[#allocation11] sm:$0x3] }
 0x317   :  { %v1113_v42 = vmax.f32 %v1108_v41, 0.0  ;;  %v3168_v41 = vld [vmem:[#allocation13 + $0x1d4] ss:$28 sps:$4 sm:$0xff]  }
 0x319   :  { %v1114_v44 = vpack.c.bf16 %v1113_v42, %v1113_v42  ;;  %v3172_v42 = vld [vmem:[#allocation13 + $0x208] ss:$28 sps:$4 sm:$0xff]  }
 0x31b   :  { %1256 = vmatmul.mubr.bf16.vlgmr.msra.gmra.mrb[4].mxu1 %v1114_v44  ;;  %v3178_v44 = vld [vmem:[#allocation13 + $0x240] ss:$28 sps:$4 sm:$0xff]  }
 0x31c   :  { %2845 = vmatpush3.bf16.msra.mxu1 %v3083_v43  ;;  %2860 = vmatprep.mubr.msk.bf16.mxu1 %vm3531_vm1, %v3530_v34  ;;  %v3174_v43 = vld [vmem:[#allocation13 + $0x20c] ss:$28 sps:$4 sm:$0xff]  }
 0x31d   :  { %2846 = vmatprep.subr.bf16.mxu1 %v3530_v34 }
 0x320   :  { %2847 = vmatpush3.bf16.msra.mxu1 %v3084_v45  ;;  %v3180_v45 = vld [vmem:[#allocation13 + $0x244] ss:$28 sps:$4 sm:$0xff]  }
 0x321   :  { %2848 = vmatprep.subr.bf16.mxu1 %v3530_v34 }
 0x324   :  { %2849 = vmatpush3.bf16.msra.mxu1 %v3085_v46  ;;  %v3184_v46 = vld [vmem:[#allocation13 + $0x278] ss:$28 sps:$4 sm:$0xff]  }
 0x325   :  { %2850 = vmatprep.subr.bf16.mxu1 %v3530_v34 }
 0x328   :  { %2851 = vmatpush3.bf16.msra.mxu1 %v3086_v47  ;;  %v3186_v47 = vld [vmem:[#allocation13 + $0x27c] ss:$28 sps:$4 sm:$0xff]  }
 0x329   :  { %2852 = vmatprep.subr.bf16.mxu1 %v3530_v34 }
 0x32c   :  { %2853 = vmatpush3.bf16.msra.mxu1 %v3087_v48  ;;  %v3190_v48 = vld [vmem:[#allocation13 + $0x2b0] ss:$28 sps:$4 sm:$0xff]  }
 0x32d   :  { %2854 = vmatprep.subr.bf16.mxu1 %v3530_v34 }
 0x330   :  { %2855 = vmatpush3.bf16.msra.mxu1 %v3088_v49  ;;  %v3192_v49 = vld [vmem:[#allocation13 + $0x2b4] ss:$28 sps:$4 sm:$0xff]  }
 0x331   :  { %2856 = vmatprep.subr.bf16.mxu1 %v3530_v34 }
 0x334   :  { %2857 = vmatpush3.bf16.msra.mxu1 %v3089_v50  ;;  %v3196_v50 = vld [vmem:[#allocation13 + $0x2e8] ss:$28 sps:$4 sm:$0xff]  }
 0x335   :  { %2858 = vmatprep.subr.bf16.mxu1 %v3530_v34  ;;  %v3148_v34 = vld [vmem:[#allocation13 + $0x128] ss:$28 sps:$4 sm:$0xff]  }
 0x336   :  { %2371 = vmatpush1.bf16.msra.mxu0 %v3148_v34  ;;  %v3213_v34 = vld [vmem:[#allocation13 + $0xc] ss:$28 sps:$4 sm:$0xff]  }
 0x337   :  { %2372 = vmatprep.subr.bf16.mxu0 %v3156_v37  ;;  %v1409_v37 = vrot.slane %v1400_v35, %v4047_v6 }
 0x338   :  { %2859 = vmatpush3.bf16.msra.mxu1 %v3090_v51  ;;  %v3198_v51 = vld [vmem:[#allocation13 + $0x2ec] ss:$28 sps:$4 sm:$0xff]  }
 0x339   :  { %1492 = vmatprep.subr.bf16.mxu1 %v3093_v52  ;;  %v2647_v52 = vld [vmem:[#allocation8] ss:$0 sm:$0xff] }
 0x33a   :  { %2373 = vmatpush1.bf16.msra.mxu0 %v3154_v36  ;;  %v1405_v36 = vrot.slane %v1400_v35, %v4041_v4  ;;  %v4106_v35 = vld [vmem:[#allocation14] sm:$0xff] }
 0x33b   :  { %2374 = vmatprep.subr.bf16.mxu0 %v3162_v39 }
 0x33e   :  { %2375 = vmatpush1.bf16.msra.mxu0 %v3160_v38 }
 0x33f   :  { %2376 = vmatprep.subr.bf16.mxu0 %v3168_v41 }
 0x342   :  { %2377 = vmatpush1.bf16.msra.mxu0 %v3166_v40 }
 0x343   :  { %2378 = vmatprep.subr.bf16.mxu0 %v3174_v43 }
 0x346   :  { %2379 = vmatpush1.bf16.msra.mxu0 %v3172_v42 }
 0x347   :  { %2380 = vmatprep.subr.bf16.mxu0 %v3180_v45 }
 0x34a   :  { %2381 = vmatpush1.bf16.msra.mxu0 %v3178_v44 }
 0x34b   :  { %2382 = vmatprep.subr.bf16.mxu0 %v3186_v47  ;;  %v3211_v47 = vld [vmem:[#allocation13 + $0x8] ss:$28 sps:$4 sm:$0xff]  }
 0x34e   :  { %2383 = vmatpush1.bf16.msra.mxu0 %v3184_v46 }
 0x34f   :  { %2384 = vmatprep.subr.bf16.mxu0 %v3192_v49  ;;  %v3216_v49 = vld [vmem:[#allocation13 + $0x44] ss:$28 sps:$4 sm:$0xff]  }
 0x352   :  { %2385 = vmatpush1.bf16.msra.mxu0 %v3190_v48 }
 0x353   :  { %2386 = vmatprep.subr.bf16.mxu0 %v3198_v51  ;;  %v3219_v51 = vld [vmem:[#allocation13 + $0x7c] ss:$28 sps:$4 sm:$0xff]  }
 0x356   :  { %2387 = vmatpush1.bf16.msra.mxu0 %v3196_v50  ;;  %v3214_v50 = vld [vmem:[#allocation13 + $0x40] ss:$28 sps:$4 sm:$0xff]  }
 0x357   :  { %2388 = vmatprep.subr.bf16.mxu0 %v3204_v28  ;;  %v3269_v28 = vld [vmem:[#allocation13 + $0x2f0] ss:$28 sps:$4 sm:$0xff]  }
 0x35a   :  { %2389 = vmatpush1.bf16.msra.mxu0 %v3202_v29  ;;  %v3270_v29 = vld [vmem:[#allocation13 + $0x130] ss:$28 sps:$4 sm:$0xff]  }
 0x35b   :  { %2390 = vmatprep.subr.bf16.mxu0 %v3210_v32  ;;  %v3273_v32 = vld [vmem:[#allocation13 + $0x360] ss:$28 sps:$4 sm:$0xff]  }
 0x35e   :  { %2391 = vmatpush1.bf16.msra.mxu0 %v3208_v33  ;;  %v3274_v33 = vld [vmem:[#allocation13 + $0x1a0] ss:$28 sps:$4 sm:$0xff]  }
 0x3ee   :  { %v1257_v56 = vpop.f32.mrb[4].mxu1 }
 0x3ef   :  { %v1258_v57 = vadd.f32 %v1257_v56, %v1136_v54  ;;  %v1259_v59 = vpop.f32.mrb[5].mxu1 }
 0x3f0   :  { %v1260_v60 = vadd.f32 %v1259_v59, %v1140_v55  ;;  %v1261_v61 = vpop.f32.mrb[6].mxu1 }
 0x3f1   :  { %2490 = vst [vmem:[%s4148_s15] sm:$0xff] %v1258_v57  ;;  %v1262_v62 = vpop.f32.mrb[7].mxu1 }
 0x3f2   :  { %v1265_v63 = vmul.f32 0.5, %v1260_v60  ;;  %2491 = vst [vmem:[%s4148_s15 + $0x8] sm:$0xff] %v1260_v60  ;;  %v3115_v60 = vld [vmem:[#allocation13] ss:$28 sps:$4 sm:$0xff]   ;;  %s2498_s15 = sshll.u32 %s3532_s1, 4  ;;  %s2499_s15 = int_to_ptr.vmem [resolvable:$true] %s2498_s15 }
 0x3f3   :  { %v3123_v62 = vld [vmem:[#allocation13 + $0x3c] ss:$28 sps:$4 sm:$0xff]   ;;  %s3481_s19 = scalar_lea.vmem %s2499_s15, 896  ;;  %p3486_p9 = scmp.lt.s32.totalorder %s2499_s15, %s2499_s15 }
 0x3f4   :  { %v1266_v0 = vmul.f32 1.442695, %v1265_v63  ;;  %v3121_v63 = vld [vmem:[#allocation13 + $0x38] ss:$28 sps:$4 sm:$0xff]   ;;  %p3482_p8 = scmp.ne.s32.totalorder %s2499_s15, %s3481_s19  ;;  %p3487_p10 = scmp.lt.s32.totalorder %s3481_s19, %s3481_s19 }
 0x3f6   :  { %3275 = vpow2.f32 %v1266_v0  ;;  %v3129_v0 = vld [vmem:[#allocation13 + $0x74] ss:$28 sps:$4 sm:$0xff]   ;;  %p3488_p11 = por %p3487_p10, %p3486_p9 }
 0x3f8   :  { %p3489_p12 = pnand %p3488_p11, %p3482_p8 }
 0x400   :  { %v3276_v2 = vpop.eup %3275 }
 0x401   :  { %v1268_v5 = vmul.f32 %v3276_v2, %v1264_v1  ;;  %v3127_v1 = vld [vmem:[#allocation13 + $0x70] ss:$28 sps:$4 sm:$0xff]  }
 0x402   :  { %v3135_v2 = vld [vmem:[#allocation13 + $0xac] ss:$28 sps:$4 sm:$0xff]  }
 0x403   :  { %v1269_v7 = vadd.f32 %v1268_v5, %v1258_v57  ;;  %v3133_v5 = vld [vmem:[#allocation13 + $0xa8] ss:$28 sps:$4 sm:$0xff]  }
 0x405   :  { %v1270_v9 = vpack.c.bf16 %v1269_v7, %v1269_v7  ;;  %v3141_v7 = vld [vmem:[#allocation13 + $0xe4] ss:$28 sps:$4 sm:$0xff]  }
 0x407   :  { %2861 = vmatmul.mubr.bf16.vlgmr.msra.gmra.mrb[8].mxu1 %v1270_v9  ;;  %v3147_v9 = vld [vmem:[#allocation13 + $0x11c] ss:$28 sps:$4 sm:$0xff]  }
 0x408   :  { %1493 = vmatpush1.bf16.msra.mxu1 %v3091_v8  ;;  %1524 = vmatprep.mubr.bf16.mxu1 %v3529_v58  ;;  %v3109_v58 = vld [vmem:[#allocation10 + $0x60] ss:$8 sps:$4 sm:$0xff]  }
 0x409   :  { %1494 = vmatprep.subr.bf16.mxu1 %v3096_v10  ;;  %v3139_v8 = vld [vmem:[#allocation13 + $0xe0] ss:$28 sps:$4 sm:$0xff]   ;;  %v3145_v10 = vld [vmem:[#allocation13 + $0x118] ss:$28 sps:$4 sm:$0xff]  }
 0x40c   :  { %1495 = vmatpush1.bf16.msra.mxu1 %v3094_v11  ;;  %v3153_v11 = vld [vmem:[#allocation13 + $0x154] ss:$28 sps:$4 sm:$0xff]  }
 0x40d   :  { %1496 = vmatprep.subr.bf16.mxu1 %v3099_v12  ;;  %v3151_v12 = vld [vmem:[#allocation13 + $0x150] ss:$28 sps:$4 sm:$0xff]  }
 0x410   :  { %1497 = vmatpush1.bf16.msra.mxu1 %v3097_v13  ;;  %v3159_v13 = vld [vmem:[#allocation13 + $0x18c] ss:$28 sps:$4 sm:$0xff]  }
 0x411   :  { %1498 = vmatprep.subr.bf16.mxu1 %v3102_v14  ;;  %v3157_v14 = vld [vmem:[#allocation13 + $0x188] ss:$28 sps:$4 sm:$0xff]  }
 0x414   :  { %1499 = vmatpush1.bf16.msra.mxu1 %v3100_v15  ;;  %v3165_v15 = vld [vmem:[#allocation13 + $0x1c4] ss:$28 sps:$4 sm:$0xff]  }
 0x415   :  { %1500 = vmatprep.subr.bf16.mxu1 %v3105_v16  ;;  %v3163_v16 = vld [vmem:[#allocation13 + $0x1c0] ss:$28 sps:$4 sm:$0xff]  }
 0x418   :  { %1501 = vmatpush1.bf16.msra.mxu1 %v3103_v17  ;;  %v3171_v17 = vld [vmem:[#allocation13 + $0x1fc] ss:$28 sps:$4 sm:$0xff]  }
 0x419   :  { %1502 = vmatprep.subr.bf16.mxu1 %v3108_v18  ;;  %v3169_v18 = vld [vmem:[#allocation13 + $0x1f8] ss:$28 sps:$4 sm:$0xff]  }
 0x41c   :  { %1503 = vmatpush1.bf16.msra.mxu1 %v3106_v19  ;;  %v3177_v19 = vld [vmem:[#allocation13 + $0x234] ss:$28 sps:$4 sm:$0xff]  }
 0x41d   :  { %1504 = vmatprep.subr.bf16.mxu1 %v3111_v20  ;;  %v3175_v20 = vld [vmem:[#allocation13 + $0x230] ss:$28 sps:$4 sm:$0xff]  }
 0x420   :  { %1505 = vmatpush1.bf16.msra.mxu1 %v3109_v58  ;;  %v3183_v58 = vld [vmem:[#allocation13 + $0x26c] ss:$28 sps:$4 sm:$0xff]  }
 0x421   :  { %1506 = vmatprep.subr.bf16.mxu1 %v3114_v21  ;;  %v3181_v21 = vld [vmem:[#allocation13 + $0x268] ss:$28 sps:$4 sm:$0xff]  }
 0x424   :  { %1507 = vmatpush1.bf16.msra.mxu1 %v3112_v22  ;;  %v3189_v22 = vld [vmem:[#allocation13 + $0x2a4] ss:$28 sps:$4 sm:$0xff]  }
 0x425   :  { %2278 = vmatprep.subr.bf16.mxu1 %v3117_v23  ;;  %v3187_v23 = vld [vmem:[#allocation13 + $0x2a0] ss:$28 sps:$4 sm:$0xff]  }
 0x4da   :  { %v1376_v53 = vpop.f32.mrb[8].mxu1 }
 0x4db   :  { %v1377_v54 = vadd.f32 %v2647_v52, %v1376_v53  ;;  %v2862_v55 = vpop.f32.mrb[9].mxu1  ;;  %v3217_v52 = vld [vmem:[#allocation13 + $0x78] ss:$28 sps:$4 sm:$0xff]  }
 0x4dc   :  { %v1379_v56 = vpop.f32.mrb[10].mxu1  ;;  %v3222_v53 = vld [vmem:[#allocation13 + $0xb4] ss:$28 sps:$4 sm:$0xff]   ;;  %v3225_v55 = vld [vmem:[#allocation13 + $0xec] ss:$28 sps:$4 sm:$0xff]  }
 0x4dd   :  { %v1382_v57 = vmax.f32 %v1377_v54, 0.0  ;;  %v2863_v59 = vpop.f32.mrb[11].mxu1  ;;  %v3220_v54 = vld [vmem:[#allocation13 + $0xb0] ss:$28 sps:$4 sm:$0xff]   ;;  %v3223_v56 = vld [vmem:[#allocation13 + $0xe8] ss:$28 sps:$4 sm:$0xff]  }
 0x4de   :  { %v3226_v59 = vld [vmem:[#allocation13 + $0x120] ss:$28 sps:$4 sm:$0xff]  }
 0x4df   :  { %v1383_v61 = vpack.c.bf16 %v1382_v57, %v1382_v57  ;;  %v3228_v57 = vld [vmem:[#allocation13 + $0x124] ss:$28 sps:$4 sm:$0xff]  }
 0x4e1   :  { %1525 = vmatmul.mubr.bf16.vlgmr.msra.gmra.mrb[12].mxu1 %v1383_v61  ;;  %v3229_v61 = vld [vmem:[#allocation13 + $0x158] ss:$28 sps:$4 sm:$0xff]  }
 0x4e2   :  { %2279 = vmatpush1.bf16.msra.mxu1 %v3115_v60  ;;  %v3231_v60 = vld [vmem:[#allocation13 + $0x15c] ss:$28 sps:$4 sm:$0xff]  }
 0x4e3   :  { %2280 = vmatprep.subr.bf16.mxu1 %v3123_v62  ;;  %v3234_v62 = vld [vmem:[#allocation13 + $0x194] ss:$28 sps:$4 sm:$0xff]  }
 0x4e6   :  { %2281 = vmatpush1.bf16.msra.mxu1 %v3121_v63  ;;  %v3232_v63 = vld [vmem:[#allocation13 + $0x190] ss:$28 sps:$4 sm:$0xff]  }
 0x4e7   :  { %2282 = vmatprep.subr.bf16.mxu1 %v3129_v0  ;;  %v3237_v0 = vld [vmem:[#allocation13 + $0x1cc] ss:$28 sps:$4 sm:$0xff]  }
 0x4ea   :  { %2283 = vmatpush1.bf16.msra.mxu1 %v3127_v1  ;;  %v3235_v1 = vld [vmem:[#allocation13 + $0x1c8] ss:$28 sps:$4 sm:$0xff]  }
 0x4eb   :  { %2284 = vmatprep.subr.bf16.mxu1 %v3135_v2  ;;  %v3240_v2 = vld [vmem:[#allocation13 + $0x204] ss:$28 sps:$4 sm:$0xff]  }
 0x4ee   :  { %2285 = vmatpush1.bf16.msra.mxu1 %v3133_v5  ;;  %v3238_v5 = vld [vmem:[#allocation13 + $0x200] ss:$28 sps:$4 sm:$0xff]  }
 0x4ef   :  { %2286 = vmatprep.subr.bf16.mxu1 %v3141_v7  ;;  %v3243_v7 = vld [vmem:[#allocation13 + $0x23c] ss:$28 sps:$4 sm:$0xff]  }
 0x4f2   :  { %2287 = vmatpush1.bf16.msra.mxu1 %v3139_v8  ;;  %v3241_v8 = vld [vmem:[#allocation13 + $0x238] ss:$28 sps:$4 sm:$0xff]  }
 0x4f3   :  { %2288 = vmatprep.subr.bf16.mxu1 %v3147_v9  ;;  %v3246_v9 = vld [vmem:[#allocation13 + $0x274] ss:$28 sps:$4 sm:$0xff]  }
 0x4f6   :  { %2289 = vmatpush1.bf16.msra.mxu1 %v3145_v10  ;;  %v3244_v10 = vld [vmem:[#allocation13 + $0x270] ss:$28 sps:$4 sm:$0xff]  }
 0x4f7   :  { %2290 = vmatprep.subr.bf16.mxu1 %v3153_v11  ;;  %v3249_v11 = vld [vmem:[#allocation13 + $0x2ac] ss:$28 sps:$4 sm:$0xff]  }
 0x4fa   :  { %2291 = vmatpush1.bf16.msra.mxu1 %v3151_v12  ;;  %v3247_v12 = vld [vmem:[#allocation13 + $0x2a8] ss:$28 sps:$4 sm:$0xff]  }
 0x4fb   :  { %2292 = vmatprep.subr.bf16.mxu1 %v3159_v13  ;;  %v3252_v13 = vld [vmem:[#allocation13 + $0x2e4] ss:$28 sps:$4 sm:$0xff]  }
 0x4fe   :  { %2293 = vmatpush1.bf16.msra.mxu1 %v3157_v14  ;;  %v3250_v14 = vld [vmem:[#allocation13 + $0x2e0] ss:$28 sps:$4 sm:$0xff]  }
 0x4ff   :  { %2294 = vmatprep.subr.bf16.mxu1 %v3165_v15  ;;  %v3255_v15 = vld [vmem:[#allocation13 + $0x31c] ss:$28 sps:$4 sm:$0xff]  }
 0x502   :  { %2295 = vmatpush1.bf16.msra.mxu1 %v3163_v16  ;;  %v3253_v16 = vld [vmem:[#allocation13 + $0x318] ss:$28 sps:$4 sm:$0xff]  }
 0x503   :  { %2296 = vmatprep.subr.bf16.mxu1 %v3171_v17  ;;  %v3258_v17 = vld [vmem:[#allocation13 + $0x354] ss:$28 sps:$4 sm:$0xff]  }
 0x506   :  { %2297 = vmatpush1.bf16.msra.mxu1 %v3169_v18  ;;  %v3256_v18 = vld [vmem:[#allocation13 + $0x350] ss:$28 sps:$4 sm:$0xff]  }
 0x507   :  { %2298 = vmatprep.subr.bf16.mxu1 %v3177_v19  ;;  %v3259_v19 = vld [vmem:[#allocation13 + $0x1d8] ss:$28 sps:$4 sm:$0xff]  }
 0x50a   :  { %2299 = vmatpush1.bf16.msra.mxu1 %v3175_v20  ;;  %v3260_v20 = vld [vmem:[#allocation13 + $0x18] ss:$28 sps:$4 sm:$0xff]  }
 0x50b   :  { %2300 = vmatprep.subr.bf16.mxu1 %v3183_v58  ;;  %v3261_v58 = vld [vmem:[#allocation13 + $0x210] ss:$28 sps:$4 sm:$0xff]  }
 0x50e   :  { %2301 = vmatpush1.bf16.msra.mxu1 %v3181_v21  ;;  %v3262_v21 = vld [vmem:[#allocation13 + $0x50] ss:$28 sps:$4 sm:$0xff]  }
 0x50f   :  { %2302 = vmatprep.subr.bf16.mxu1 %v3189_v22  ;;  %v3263_v22 = vld [vmem:[#allocation13 + $0x248] ss:$28 sps:$4 sm:$0xff]  }
 0x512   :  { %2303 = vmatpush1.bf16.msra.mxu1 %v3187_v23  ;;  %v3264_v23 = vld [vmem:[#allocation13 + $0x88] ss:$28 sps:$4 sm:$0xff]  }
 0x513   :  { %2304 = vmatprep.subr.bf16.mxu1 %v3195_v24  ;;  %v3265_v24 = vld [vmem:[#allocation13 + $0x280] ss:$28 sps:$4 sm:$0xff]  }
 0x516   :  { %2305 = vmatpush1.bf16.msra.mxu1 %v3193_v25  ;;  %v3266_v25 = vld [vmem:[#allocation13 + $0xc0] ss:$28 sps:$4 sm:$0xff]  }
 0x517   :  { %2306 = vmatprep.subr.bf16.mxu1 %v3201_v26  ;;  %v3267_v26 = vld [vmem:[#allocation13 + $0x2b8] ss:$28 sps:$4 sm:$0xff]  }
 0x51a   :  { %2307 = vmatpush1.bf16.msra.mxu1 %v3199_v27  ;;  %v3268_v27 = vld [vmem:[#allocation13 + $0xf8] ss:$28 sps:$4 sm:$0xff]  }
 0x51b   :  { %2308 = vmatprep.subr.bf16.mxu1 %v3207_v30  ;;  %v3271_v30 = vld [vmem:[#allocation13 + $0x328] ss:$28 sps:$4 sm:$0xff]  }
 0x51e   :  { %2309 = vmatpush1.bf16.msra.mxu1 %v3205_v31  ;;  %v3272_v31 = vld [vmem:[#allocation13 + $0x168] ss:$28 sps:$4 sm:$0xff]  }
 0x51f   :  { %2319 = vmatprep.subr.bf16.mxu1 %v3213_v34  ;;  %v1685_v34 = vsub.s32 4, %v4038_v3 }
 0x5b4   :  { %v1526_v38 = vpop.f32.mrb[12].mxu1 }
 0x5b5   :  { %v1527_v39 = vadd.f32 %v1526_v38, %v1405_v36  ;;  %v1528_v40 = vpop.f32.mrb[13].mxu1  ;;  %v1689_v36 = vsub.s32 5, %v4038_v3  ;;  %v1686_v38 = vrot.slane %v4106_v35, %v1685_v34 }
 0x5b6   :  { %v1529_v41 = vadd.f32 %v1528_v40, %v1409_v37  ;;  %v1530_v42 = vpop.f32.mrb[14].mxu1  ;;  %v1670_v37 = vrot.slane %v4106_v35, %v4041_v4 }
 0x5b7   :  { %v1533_v43 = vmax.f32 %v1527_v39, 0.0  ;;  %v1531_v44 = vpop.f32.mrb[15].mxu1  ;;  %v1674_v39 = vrot.slane %v4106_v35, %v4047_v6  ;;  %v1690_v40 = vrot.slane %v4106_v35, %v1689_v36 }
 0x5b8   :  { %v1534_v45 = vmax.f32 %v1529_v41, 0.0 }
 0x5b9   :  { %v4095_v48 = vpack.c.bf16 %v1533_v43, %v1533_v43 }
 0x5ba   :  { %v4093_v46 = vpack.c.bf16 %v1534_v45, %v1534_v45 }
 0x5bc   :  { %2310 = vmatprep.mubr.bf16.mxu1 %v4093_v46  ;;  %2392 = vmatprep.mubr.bf16.mxu0 %v4093_v46 }
 0x5bd   :  { %2311 = vmatmul.mubr.bf16.vlgmr.msra.gmra.mrb[16].mxu1 %v4095_v48  ;;  %2393 = vmatmul.mubr.bf16.vlgmr.msra.gmra.mrb[4].mxu0 %v4095_v48 }
 0x5be   :  { %2320 = vmatpush1.bf16.msra.mxu1 %v3211_v47  ;;  %2351 = vmatprep.mubr.bf16.mxu1 %v4093_v46 }
 0x5bf   :  { %2321 = vmatprep.subr.bf16.mxu1 %v3216_v49 }
 0x5c2   :  { %2322 = vmatpush1.bf16.msra.mxu1 %v3214_v50 }
 0x5c3   :  { %2323 = vmatprep.subr.bf16.mxu1 %v3219_v51 }
 0x5c6   :  { %2324 = vmatpush1.bf16.msra.mxu1 %v3217_v52 }
 0x5c7   :  { %2325 = vmatprep.subr.bf16.mxu1 %v3222_v53 }
 0x5ca   :  { %2326 = vmatpush1.bf16.msra.mxu1 %v3220_v54 }
 0x5cb   :  { %2327 = vmatprep.subr.bf16.mxu1 %v3225_v55 }
 0x5ce   :  { %2328 = vmatpush1.bf16.msra.mxu1 %v3223_v56 }
 0x5cf   :  { %2329 = vmatprep.subr.bf16.mxu1 %v3228_v57 }
 0x5d2   :  { %2330 = vmatpush1.bf16.msra.mxu1 %v3226_v59 }
 0x5d3   :  { %2331 = vmatprep.subr.bf16.mxu1 %v3231_v60 }
 0x5d6   :  { %2332 = vmatpush1.bf16.msra.mxu1 %v3229_v61 }
 0x5d7   :  { %2333 = vmatprep.subr.bf16.mxu1 %v3234_v62 }
 0x5da   :  { %2334 = vmatpush1.bf16.msra.mxu1 %v3232_v63 }
 0x5db   :  { %2335 = vmatprep.subr.bf16.mxu1 %v3237_v0 }
 0x5de   :  { %2336 = vmatpush1.bf16.msra.mxu1 %v3235_v1 }
 0x5df   :  { %2337 = vmatprep.subr.bf16.mxu1 %v3240_v2 }
 0x5e2   :  { %2338 = vmatpush1.bf16.msra.mxu1 %v3238_v5 }
 0x5e3   :  { %2339 = vmatprep.subr.bf16.mxu1 %v3243_v7  ;;  %v1677_v7 = vsub.s32 2, %v4038_v3 }
 0x5e6   :  { %2340 = vmatpush1.bf16.msra.mxu1 %v3241_v8  ;;  %v1681_v8 = vsub.s32 3, %v4038_v3 }
 0x5e7   :  { %2341 = vmatprep.subr.bf16.mxu1 %v3246_v9  ;;  %v1678_v9 = vrot.slane %v4106_v35, %v1677_v7 }
 0x5ea   :  { %2342 = vmatpush1.bf16.msra.mxu1 %v3244_v10  ;;  %v1682_v10 = vrot.slane %v4106_v35, %v1681_v8 }
 0x5eb   :  { %2343 = vmatprep.subr.bf16.mxu1 %v3249_v11 }
 0x5ee   :  { %2344 = vmatpush1.bf16.msra.mxu1 %v3247_v12 }
 0x5ef   :  { %2345 = vmatprep.subr.bf16.mxu1 %v3252_v13 }
 0x5f2   :  { %2346 = vmatpush1.bf16.msra.mxu1 %v3250_v14 }
 0x5f3   :  { %2347 = vmatprep.subr.bf16.mxu1 %v3255_v15 }
 0x5f6   :  { %2348 = vmatpush1.bf16.msra.mxu1 %v3253_v16 }
 0x5f7   :  { %2349 = vmatprep.subr.bf16.mxu1 %v3258_v17 }
 0x5fa   :  { %2350 = vmatpush1.bf16.msra.mxu1 %v3256_v18 }
 0x5fb   :  { %2822 = vmatprep.subr.bf16.mxu1 %v3259_v19 }
 0x5fd   :  { %2352 = vmatmul.mubr.bf16.vlgmr.msra.gmra.mrb[20].mxu1 %v4095_v48 }
 0x5fe   :  { %2823 = vmatpush3.bf16.msra.mxu1 %v3260_v20  ;;  %2433 = vmatprep.mubr.bf16.mxu1 %v4093_v46 }
 0x5ff   :  { %2824 = vmatprep.subr.bf16.mxu1 %v3261_v58 }
 0x602   :  { %2825 = vmatpush3.bf16.msra.mxu1 %v3262_v21 }
 0x603   :  { %2826 = vmatprep.subr.bf16.mxu1 %v3263_v22 }
 0x606   :  { %2827 = vmatpush3.bf16.msra.mxu1 %v3264_v23  ;;  %v1693_v23 = vsub.s32 6, %v4038_v3 }
 0x607   :  { %2828 = vmatprep.subr.bf16.mxu1 %v3265_v24 }
 0x60a   :  { %2829 = vmatpush3.bf16.msra.mxu1 %v3266_v25 }
 0x60b   :  { %2830 = vmatprep.subr.bf16.mxu1 %v3267_v26  ;;  %v1694_v26 = vrot.slane %v4106_v35, %v1693_v23 }
 0x60e   :  { %2831 = vmatpush3.bf16.msra.mxu1 %v3268_v27 }
 0x60f   :  { %2832 = vmatprep.subr.bf16.mxu1 %v3269_v28 }
 0x612   :  { %2833 = vmatpush3.bf16.msra.mxu1 %v3270_v29 }
 0x613   :  { %2834 = vmatprep.subr.bf16.mxu1 %v3271_v30 }
 0x616   :  { %2835 = vmatpush3.bf16.msra.mxu1 %v3272_v31 }
 0x617   :  { %2836 = vmatprep.subr.bf16.mxu1 %v3273_v32 }
 0x61a   :  { %2837 = vmatpush3.bf16.msra.mxu1 %v3274_v33 }
 0x61d   :  { %2434 = vmatmul.mubr.bf16.vlgmr.msra.gmra.mrb[24].mxu1 %v4095_v48 }
 0x690   :  { %v2312_v41 = vpop.f32.mrb[16].mxu1  ;;  %v2394_v42 = vpop.f32.mrb[4].mxu0 }
 0x691   :  { %v2313_v43 = vadd.f32 %v2312_v41, %v1670_v37  ;;  %v2395_v44 = vadd.f32 %v2394_v42, %v1686_v38  ;;  %v2314_v45 = vpop.f32.mrb[17].mxu1  ;;  %v2396_v46 = vpop.f32.mrb[5].mxu0 }
 0x692   :  { %v2315_v47 = vadd.f32 %v2314_v45, %v1674_v39  ;;  %v2397_v48 = vadd.f32 %v2396_v46, %v1690_v40  ;;  %v2316_v49 = vpop.f32.mrb[18].mxu1  ;;  %v2398_v50 = vpop.f32.mrb[6].mxu0 }
 0x693   :  { %v2784_v51 = vmul.f32 -1.442695, %v2313_v43  ;;  %v2788_v52 = vmul.f32 -1.442695, %v2395_v44  ;;  %v2317_v4 = vpop.f32.mrb[19].mxu1  ;;  %v2399_v53 = vpop.f32.mrb[7].mxu0 }
 0x694   :  { %v2785_v54 = vmul.f32 -1.442695, %v2315_v47  ;;  %v2789_v55 = vmul.f32 -1.442695, %v2397_v48 }
 0x695   :  { %3277 = vpow2.f32 %v2784_v51 }
 0x696   :  { %3279 = vpow2.f32 %v2788_v52 }
 0x697   :  { %3281 = vpow2.f32 %v2785_v54 }
 0x698   :  { %3283 = vpow2.f32 %v2789_v55 }
 0x69f   :  { %v3278_v6 = vpop.eup %3277 }
 0x6a0   :  { %v3280_v56 = vpop.eup %3279  ;;  %v2462_v57 = vadd.f32 1.0, %v3278_v6 }
 0x6a1   :  { %v3282_v59 = vpop.eup %3281  ;;  %v2466_v60 = vadd.f32 1.0, %v3280_v56 }
 0x6a2   :  { %v3284_v61 = vpop.eup %3283  ;;  %3285 = vrcp.f32 %v2462_v57  ;;  %v2463_v62 = vadd.f32 1.0, %v3282_v59 }
 0x6a3   :  { %3287 = vrcp.f32 %v2466_v60  ;;  %v2467_v63 = vadd.f32 1.0, %v3284_v61 }
 0x6a4   :  { %3289 = vrcp.f32 %v2463_v62 }
 0x6a5   :  { %3291 = vrcp.f32 %v2467_v63 }
 0x6ac   :  { %v3286_v0 = vpop.eup %3285 }
 0x6ad   :  { %v3288_v1 = vpop.eup %3287  ;;  %2483 = vst [vmem:[#allocation16] sm:$0xff] %v3286_v0 }
 0x6ae   :  { %v3290_v2 = vpop.eup %3289  ;;  %2487 = vst [vmem:[#allocation16 + $0x20] sm:$0xff] %v3288_v1 }
 0x6af   :  { %v3292_v5 = vpop.eup %3291  ;;  %2484 = vst [vmem:[#allocation16 + $0x8] sm:$0xff] %v3290_v2 }
 0x6b0   :  { %2488 = vst [vmem:[#allocation16 + $0x28] sm:$0xff] %v3292_v5 }
 0x6d0   :  { %v2353_v11 = vpop.f32.mrb[20].mxu1 }
 0x6d1   :  { %v2354_v12 = vadd.f32 %v2353_v11, %v1678_v9  ;;  %v2355_v13 = vpop.f32.mrb[21].mxu1 }
 0x6d2   :  { %v2356_v14 = vadd.f32 %v2355_v13, %v1682_v10  ;;  %v2357_v15 = vpop.f32.mrb[22].mxu1 }
 0x6d3   :  { %v2786_v16 = vmul.f32 -1.442695, %v2354_v12  ;;  %v2358_v17 = vpop.f32.mrb[23].mxu1 }
 0x6d4   :  { %v2787_v18 = vmul.f32 -1.442695, %v2356_v14 }
 0x6d5   :  { %3293 = vpow2.f32 %v2786_v16 }
 0x6d6   :  { %3295 = vpow2.f32 %v2787_v18 }
 0x6df   :  { %v3294_v19 = vpop.eup %3293 }
 0x6e0   :  { %v3296_v20 = vpop.eup %3295  ;;  %v2464_v58 = vadd.f32 1.0, %v3294_v19 }
 0x6e1   :  { %v2465_v21 = vadd.f32 1.0, %v3296_v20 }
 0x6e2   :  { %3297 = vrcp.f32 %v2464_v58 }
 0x6e3   :  { %3299 = vrcp.f32 %v2465_v21 }
 0x6ec   :  { %v3298_v22 = vpop.eup %3297 }
 0x6ed   :  { %v3300_v24 = vpop.eup %3299  ;;  %2485 = vst [vmem:[#allocation16 + $0x10] sm:$0xff] %v3298_v22 }
 0x6ee   :  { %2486 = vst [vmem:[#allocation16 + $0x18] sm:$0xff] %v3300_v24 }
 0x6f0   :  { %v2838_v25 = vpop.f32.mrb[24].mxu1 }
 0x6f1   :  { %v2839_v27 = vpop.f32.mrb[25].mxu1 }
 0x6f2   :  { %v2840_v28 = vadd.f32 %v2839_v27, %v2838_v25  ;;  %v2841_v29 = vpop.f32.mrb[26].mxu1 }
 0x6f3   :  { %v2842_v30 = vpop.f32.mrb[27].mxu1 }
 0x6f4   :  { %v2436_v31 = vadd.f32 %v2840_v28, %v1694_v26 }
 0x6f6   :  { %v2790_v32 = vmul.f32 -1.442695, %v2436_v31 }
 0x6f8   :  { %3301 = vpow2.f32 %v2790_v32 }
 0x702   :  { %v3302_v33 = vpop.eup %3301 }
 0x703   :  { %v2468_v34 = vadd.f32 1.0, %v3302_v33 }
 0x705   :  { %3303 = vrcp.f32 %v2468_v34 }
 0x70f   :  { %v3304_v3 = vpop.eup %3303 }
 0x710   :  { %2489 = vst [vmem:[#allocation16 + $0x30] sm:$0xff] %v3304_v3 }
 0x711   :  { %3492 = shalt.err (!%p3489_p12)
}
 0x712   :  { %s4151_s0 = sld [smem:[#allocation23_spill]] }
 0x718   :  { %s3493_s2 = scalar_lea.hbm %s4151_s0, 896 }
 0x719   :  { %p3494_p13 = scmp.ne.s32.totalorder %s4151_s0, %s3493_s2  ;;  %p3497_p0 = scmp.lt.u32.totalorder %s3493_s2, %s4151_s0 }
 0x71b   :  { %p3499_p1 = pnand %p3497_p0, %p3494_p13 }
 0x71d   :  { %3502 = shalt.err (!%p3499_p1)
}
 0x71e   :  { %2501 = dma.vmem_to_hbm [thread:$0]  %s2499_s15, 896, %s4151_s0, [#allocation4]  }
 0x71f   :  { %3513 = dma.done.wait [#allocation4], 896  }
 0x720   :  { %3514 = vsyncadd [#allocation4], 4294966400 }
 0x721   :  { %2509 = vsyncpa [#allocation3], 1 }
 0x722   :  { %2510 = vsyncpa [#allocation6], 1 }
 0x723   :  { %2511 = vsyncpa [#allocation9], 1 }
 0x724   :  { %2512 = vsyncpa [#allocation12], 1 }
 0x725   :  { %2513 = vsyncpa [#allocation15], 1 }
 0x726   :  { %2514 = vsyncpa [#allocation4], 1 }

</bundles_post_ra>
